<compile_context>
chip_gen: v7x
topology: tpu7x:2x2x1
jax: 0.10.0
libtpu: 0.0.40
codegen_flags: <defaults>
</compile_context>

<pallas_src>
import math
import functools

import jax
import jax.numpy as jnp
from jax.experimental import pallas as pl
from jax.experimental.pallas import tpu as pltpu


# ---------------------------------------------------------------------------
# Device-generation-aware tile caps
# ---------------------------------------------------------------------------

@functools.lru_cache(maxsize=None)
def _device_caps():
    kind = ""
    try:
        d = jax.devices()[0]
        if d.platform == "tpu":
            kind = str(getattr(d, "device_kind", "")).lower()
    except Exception:
        pass
    # v2..v6 parts have 128 MiB VMEM -> bigger tiles, higher scoped-vmem limit.
    big_vmem = any(t in kind for t in ("v2", "v3", "v4", "v5", "v6"))
    if big_vmem:
        return {"tm_cap": 1024, "tn_cap": 512, "tk_cap": 1024,
                "vmem_limit": 96 * 1024 * 1024}
    # v7x (64 MiB VMEM) or unknown: conservative.
    return {"tm_cap": 512, "tn_cap": 256, "tk_cap": 512,
            "vmem_limit": 48 * 1024 * 1024}


def _largest_divisor_multiple(dim, base, cap):
    """Largest multiple of `base` that divides `dim` and is <= cap, else None."""
    t = (min(dim, cap) // base) * base
    while t >= base:
        if dim % t == 0:
            return t
        t -= base
    return None


# ---------------------------------------------------------------------------
# Tiled linear (x @ W + b) kernel
# ---------------------------------------------------------------------------

def _linear_kernel(x_ref, w_ref, b_ref, o_ref, acc_ref, *, compute_dtype):
    k = pl.program_id(2)

    @pl.when(k == 0)
    def _():
        acc_ref[...] = jnp.zeros_like(acc_ref)

    acc_ref[...] += jnp.dot(
        x_ref[...].astype(compute_dtype),
        w_ref[...].astype(compute_dtype),
        preferred_element_type=jnp.float32,
    )

    @pl.when(k == pl.num_programs(2) - 1)
    def _():
        o_ref[...] = (acc_ref[...] + b_ref[...].astype(jnp.float32)).astype(o_ref.dtype)


def linear_pallas(x2d, w, b, *, compute_dtype, out_dtype=None, caps=None):
    """x2d: (M, K), w: (K, N) [= torch weight.T], b: (N,) -> (M, N) in out_dtype."""
    M, K = x2d.shape
    Kw, N = w.shape
    assert K == Kw and b.shape == (N,)
    out_dtype = out_dtype or x2d.dtype
    caps = caps or _device_caps()

    # M tile: multiple of 8 (cap is) or the full dimension.
    tm = M if M <= caps["tm_cap"] else caps["tm_cap"]
    # N tile: prefer multiples of 256 (full-width MXU), then 128, else full N.
    tn = (_largest_divisor_multiple(N, 256, caps["tn_cap"])
          or _largest_divisor_multiple(N, 128, caps["tn_cap"])
          or N)
    # K tile: must divide K exactly (no padded-K accumulator corruption).
    tk = (_largest_divisor_multiple(K, 256, caps["tk_cap"])
          or _largest_divisor_multiple(K, 128, caps["tk_cap"])
          or K)

    grid = (pl.cdiv(M, tm), pl.cdiv(N, tn), K // tk)
    kernel = functools.partial(_linear_kernel, compute_dtype=compute_dtype)

    return pl.pallas_call(
        kernel,
        out_shape=jax.ShapeDtypeStruct((M, N), out_dtype),
        grid=grid,
        in_specs=[
            pl.BlockSpec((tm, tk), lambda i, j, k: (i, k)),
            pl.BlockSpec((tk, tn), lambda i, j, k: (k, j)),
            pl.BlockSpec((1, tn), lambda i, j, k: (0, j)),
        ],
        out_specs=pl.BlockSpec((tm, tn), lambda i, j, k: (i, j)),
        scratch_shapes=[pltpu.VMEM((tm, tn), jnp.float32)],
        compiler_params=pltpu.CompilerParams(
            dimension_semantics=("parallel", "parallel", "arbitrary"),
            vmem_limit_bytes=caps["vmem_limit"],
        ),
    )(x2d, w, b.reshape(1, N))


def _proj3d(x_btc, w, b, *, compute_dtype, out_dtype, caps):
    B, T, C = x_btc.shape
    N = w.shape[1]
    out = linear_pallas(x_btc.reshape(B * T, C), w, b,
                        compute_dtype=compute_dtype, out_dtype=out_dtype, caps=caps)
    return out.reshape(B, T, N)


# ---------------------------------------------------------------------------
# Fused co-attention kernel (both cross-attentions, all heads, per batch element)
# ---------------------------------------------------------------------------

def _co_attn_kernel(img_qkv_ref, bh_qkv_ref, o_img_ref, o_bh_ref, *,
                    n_head, c_img, c_bh):
    # img_qkv_ref: (T_img, 3*C_img) = [q_img | k_img->bh | v_img->bh]   (batch dim squeezed)
    # bh_qkv_ref : (T_bh,  3*C_bh ) = [q_bh  | k_bh->img | v_bh->img]
    hs_img = c_img // n_head
    hs_bh = c_bh // n_head

    def cross_attn_head(q_ref, kv_ref, o_ref, h, hs_q, c_kv, hs_kv):
        # Module scales by 1/sqrt(head_size of the keys); fold it into q (the
        # smallest tensor, T_q x hs) instead of the T_q x T_kv score matrix.
        scale = 1.0 / math.sqrt(hs_kv)
        # Direct Ref lane-slices: only this head's working set is loaded.
        qh = q_ref[:, h * hs_q:(h + 1) * hs_q] * scale
        kh = kv_ref[:, c_kv + h * hs_kv: c_kv + (h + 1) * hs_kv]
        vh = kv_ref[:, 2 * c_kv + h * hs_kv: 2 * c_kv + (h + 1) * hs_kv]
        # Contract the last axes directly -> no explicit k.T (no XLU transpose).
        s = jax.lax.dot_general(qh, kh, (((1,), (1,)), ((), ())),
                                preferred_element_type=jnp.float32)
        s = s - jnp.max(s, axis=-1, keepdims=True)          # stable softmax
        p = jnp.exp(s)
        p = p * pl.reciprocal(jnp.sum(p, axis=-1, keepdims=True), approx=True)
        out = jnp.dot(p.astype(vh.dtype), vh, preferred_element_type=jnp.float32)
        # Store this head's result immediately (lane slice of the [T, C] block).
        o_ref[:, h * hs_q:(h + 1) * hs_q] = out.astype(o_ref.dtype)

    # TODO(synk): on v6e/v7x a head-batched einsum (head as batch dim) would fill the
    # 256-wide MXU better; kept per-head to avoid in-VMEM relayouts for small head sizes.
    for h in range(n_head):
        # img queries attend over bh keys/values.
        cross_attn_head(img_qkv_ref, bh_qkv_ref, o_img_ref, h, hs_img, c_bh, hs_bh)
        # bh queries attend over img keys/values.
        cross_attn_head(bh_qkv_ref, img_qkv_ref, o_bh_ref, h, hs_bh, c_img, hs_img)


def co_attention_pallas(img_qkv, bh_qkv, *, n_head, c_img, c_bh, out_dtype, caps):
    B, T_img, tc_img = img_qkv.shape
    B2, T_bh, tc_bh = bh_qkv.shape
    assert B == B2 and tc_img == 3 * c_img and tc_bh == 3 * c_bh

    kernel = functools.partial(_co_attn_kernel, n_head=n_head, c_img=c_img, c_bh=c_bh)
    # TODO(synk): for very long sequences on v7x (64 MiB VMEM, 2 cores), add a query-tile
    # grid axis and block the q stream as (1, tq, 3C) to bound VMEM / use both cores.
    return pl.pallas_call(
        kernel,
        out_shape=(jax.ShapeDtypeStruct((B, T_img, c_img), out_dtype),
                   jax.ShapeDtypeStruct((B, T_bh, c_bh), out_dtype)),
        grid=(B,),
        in_specs=[
            pl.BlockSpec((pl.Squeezed(), T_img, tc_img), lambda b: (b, 0, 0)),
            pl.BlockSpec((pl.Squeezed(), T_bh, tc_bh), lambda b: (b, 0, 0)),
        ],
        out_specs=(
            pl.BlockSpec((pl.Squeezed(), T_img, c_img), lambda b: (b, 0, 0)),
            pl.BlockSpec((pl.Squeezed(), T_bh, c_bh), lambda b: (b, 0, 0)),
        ),
        compiler_params=pltpu.CompilerParams(
            dimension_semantics=("parallel",),
            vmem_limit_bytes=caps["vmem_limit"],
        ),
    )(img_qkv, bh_qkv)


# ---------------------------------------------------------------------------
# co_attentional forward
# ---------------------------------------------------------------------------

def fuse_qkv_params(params):
    """Concatenate per-stream Q/K/V weights into single [C, 3C] matmuls."""
    return {
        "w_qkv_img": jnp.concatenate(
            [params["w_query_img"], params["w_key_img_to_bh"], params["w_value_img_to_bh"]], axis=1),
        "b_qkv_img": jnp.concatenate(
            [params["b_query_img"], params["b_key_img_to_bh"], params["b_value_img_to_bh"]]),
        "w_qkv_bh": jnp.concatenate(
            [params["w_query_bh"], params["w_key_bh_to_img"], params["w_value_bh_to_img"]], axis=1),
        "b_qkv_bh": jnp.concatenate(
            [params["b_query_bh"], params["b_key_bh_to_img"], params["b_value_bh_to_img"]]),
        "w_proj_img": params["w_proj_img"], "b_proj_img": params["b_proj_img"],
        "w_proj_bh": params["w_proj_bh"], "b_proj_bh": params["b_proj_bh"],
    }


@functools.partial(jax.jit, static_argnames=("n_head", "compute_dtype"))
def co_attentional_forward(fparams, x_img, y_bh, n_head, compute_dtype=jnp.bfloat16):
    # TODO(synk): optional attention_mask / img_attention_mask path not implemented
    # (module default is None); only the mask-free branch is reproduced.
    B_img, T_img, C_img = x_img.shape
    B_bh, T_bh, C_bh = y_bh.shape
    assert C_img % n_head == 0 and C_bh % n_head == 0
    assert C_img // n_head == C_bh // n_head and B_img == B_bh

    caps = _device_caps()

    # Fused Q/K/V projections, emitted in compute_dtype (halves HBM traffic on bf16 path).
    img_qkv = _proj3d(x_img, fparams["w_qkv_img"], fparams["b_qkv_img"],
                      compute_dtype=compute_dtype, out_dtype=compute_dtype, caps=caps)
    bh_qkv = _proj3d(y_bh, fparams["w_qkv_bh"], fparams["b_qkv_bh"],
                     compute_dtype=compute_dtype, out_dtype=compute_dtype, caps=caps)

    # Both cross-attentions in one kernel; outputs already in [B, T, C] layout.
    att_img, att_bh = co_attention_pallas(
        img_qkv, bh_qkv, n_head=n_head, c_img=C_img, c_bh=C_bh,
        out_dtype=compute_dtype, caps=caps)

    out_img = _proj3d(att_img, fparams["w_proj_img"], fparams["b_proj_img"],
                      compute_dtype=compute_dtype, out_dtype=x_img.dtype, caps=caps)
    out_bh = _proj3d(att_bh, fparams["w_proj_bh"], fparams["b_proj_bh"],
                     compute_dtype=compute_dtype, out_dtype=y_bh.dtype, caps=caps)
    return out_img, out_bh


# ---------------------------------------------------------------------------
# Pure-JAX reference (for correctness check)
# ---------------------------------------------------------------------------

def co_attentional_reference(params, x_img, y_bh, n_head):
    def lin(x, w, b):
        return x @ w + b

    def heads(x, nh):
        B, T, C = x.shape
        return x.reshape(B, T, nh, C // nh).transpose(0, 2, 1, 3)

    B_img, T_img, C_img = x_img.shape
    B_bh, T_bh, C_bh = y_bh.shape
    q_img = heads(lin(x_img, params["w_query_img"], params["b_query_img"]), n_head)
    k_f_img = heads(lin(x_img, params["w_key_img_to_bh"], params["b_key_img_to_bh"]), n_head)
    v_f_img = heads(lin(x_img, params["w_value_img_to_bh"], params["b_value_img_to_bh"]), n_head)
    q_bh = heads(lin(y_bh, params["w_query_bh"], params["b_query_bh"]), n_head)
    k_f_bh = heads(lin(y_bh, params["w_key_bh_to_img"], params["b_key_bh_to_img"]), n_head)
    v_f_bh = heads(lin(y_bh, params["w_value_bh_to_img"], params["b_value_bh_to_img"]), n_head)

    att_img = (q_img @ jnp.swapaxes(k_f_bh, -2, -1)) * (1.0 / math.sqrt(k_f_bh.shape[-1]))
    att_img = jax.nn.softmax(att_img, axis=-1)
    out_img = (att_img @ v_f_bh).transpose(0, 2, 1, 3).reshape(B_img, T_img, C_img)
    out_img = lin(out_img, params["w_proj_img"], params["b_proj_img"])

    att_bh = (q_bh @ jnp.swapaxes(k_f_img, -2, -1)) * (1.0 / math.sqrt(k_f_img.shape[-1]))
    att_bh = jax.nn.softmax(att_bh, axis=-1)
    out_bh = (att_bh @ v_f_img).transpose(0, 2, 1, 3).reshape(B_bh, T_bh, C_bh)
    out_bh = lin(out_bh, params["w_proj_bh"], params["b_proj_bh"])
    return out_img, out_bh


# ---------------------------------------------------------------------------
# Deterministic parameter init + demo
# ---------------------------------------------------------------------------

def init_params(key, n_img_embd, n_bh_embd):
    names = [
        ("value_img_to_bh", n_img_embd, n_img_embd),
        ("key_img_to_bh", n_img_embd, n_img_embd),
        ("query_img", n_img_embd, n_img_embd),
        ("value_bh_to_img", n_bh_embd, n_bh_embd),
        ("key_bh_to_img", n_bh_embd, n_bh_embd),
        ("query_bh", n_bh_embd, n_bh_embd),
        ("proj_img", n_img_embd, n_img_embd),
        ("proj_bh", n_bh_embd, n_bh_embd),
    ]
    params = {}
    for name, fan_in, fan_out in names:
        key, kw, kb = jax.random.split(key, 3)
        bound = 1.0 / math.sqrt(fan_in)
        # stored as (in, out) = torch weight.T
        params[f"w_{name}"] = jax.random.uniform(
            kw, (fan_in, fan_out), jnp.float32, -bound, bound)
        params[f"b_{name}"] = jax.random.uniform(
            kb, (fan_out,), jnp.float32, -bound, bound)
    return params


if __name__ == "__main__":
    # small config consistent with the module: head_size must match across streams
    n_img_embd = 32
    n_bh_embd = 32
    n_head = 4
    B, T_img, T_bh = 2, 16, 8

    key = jax.random.PRNGKey(0)
    k_params, k_ximg, k_ybh = jax.random.split(key, 3)
    params = init_params(k_params, n_img_embd, n_bh_embd)
    fparams = fuse_qkv_params(params)
    x_img = jax.random.normal(k_ximg, (B, T_img, n_img_embd), jnp.float32)
    y_bh = jax.random.normal(k_ybh, (B, T_bh, n_bh_embd), jnp.float32)

    ref_img, ref_bh = co_attentional_reference(params, x_img, y_bh, n_head)

    # f32 compute path (approx reciprocal in softmax -> tolerance slightly loosened)
    out_img, out_bh = co_attentional_forward(
        fparams, x_img, y_bh, n_head=n_head, compute_dtype=jnp.float32)
    jax.block_until_ready((out_img, out_bh))
    assert out_img.shape == (B, T_img, n_img_embd)
    assert out_bh.shape == (B, T_bh, n_bh_embd)
    assert jnp.allclose(out_img, ref_img, atol=1e-2, rtol=1e-2)
    assert jnp.allclose(out_bh, ref_bh, atol=1e-2, rtol=1e-2)

    # bf16 MXU path (f32 accumulation, bf16 intermediates) -- the recommended configuration
    out_img16, out_bh16 = co_attentional_forward(
        fparams, x_img, y_bh, n_head=n_head, compute_dtype=jnp.bfloat16)
    jax.block_until_ready((out_img16, out_bh16))
    assert jnp.allclose(out_img16, ref_img, atol=7e-2, rtol=7e-2)
    assert jnp.allclose(out_bh16, ref_bh, atol=7e-2, rtol=7e-2)

    print("KERNEL_OK")
</pallas_src>

<mosaic_0001>
module attributes {stable_mosaic.version = 11 : i64} {
  func.func @_co_attn_kernel(%arg0: i32, %arg1: memref<1x16x96xf32, #tpu.memory_space<vmem>>, %arg2: memref<1x8x96xf32, #tpu.memory_space<vmem>>, %arg3: memref<1x16x32xf32, #tpu.memory_space<vmem>>, %arg4: memref<1x8x32xf32, #tpu.memory_space<vmem>>) attributes {dimension_semantics = [#tpu.dimension_semantics<parallel>], iteration_bounds = array<i64: 2>, scalar_prefetch = 0 : i64, scratch_operands = 0 : i64, tpu.core_type = #tpu.core_type<tc>, window_params = [{transform_indices = @transform_0, window_bounds = array<i64: 1, 16, 96>}, {transform_indices = @transform_1, window_bounds = array<i64: 1, 8, 96>}, {transform_indices = @transform_2, window_bounds = array<i64: 1, 16, 32>}, {transform_indices = @transform_3, window_bounds = array<i64: 1, 8, 32>}]} {
    %c0 = arith.constant 0 : index
    %c0_0 = arith.constant 0 : index
    %c0_1 = arith.constant 0 : index
    %0 = vector.load %arg1[%c0, %c0_0, %c0_1] : memref<1x16x96xf32, #tpu.memory_space<vmem>>, vector<1x16x8xf32>
    %1 = vector.shape_cast %0 : vector<1x16x8xf32> to vector<16x8xf32>
    %cst = arith.constant 0.353553385 : f32
    %2 = vector.broadcast %cst : f32 to vector<16x8xf32>
    %3 = arith.mulf %1, %2 : vector<16x8xf32>
    %c0_2 = arith.constant 0 : index
    %c0_3 = arith.constant 0 : index
    %c32 = arith.constant 32 : index
    %4 = vector.load %arg2[%c0_2, %c0_3, %c32] : memref<1x8x96xf32, #tpu.memory_space<vmem>>, vector<1x8x8xf32>
    %5 = vector.shape_cast %4 : vector<1x8x8xf32> to vector<8x8xf32>
    %c0_4 = arith.constant 0 : index
    %c0_5 = arith.constant 0 : index
    %c64 = arith.constant 64 : index
    %6 = vector.load %arg2[%c0_4, %c0_5, %c64] : memref<1x8x96xf32, #tpu.memory_space<vmem>>, vector<1x8x8xf32>
    %7 = vector.shape_cast %6 : vector<1x8x8xf32> to vector<8x8xf32>
    %cst_6 = arith.constant dense<0.000000e+00> : vector<16x8xf32>
    %8 = tpu.matmul %3, %5, %cst_6 {dimension_numbers = #tpu.dot_dimension_numbers<[1], [1], [0], [0], [0, 0, 1, 0], [], []>} : vector<16x8xf32>, vector<8x8xf32>, vector<16x8xf32> -> vector<16x8xf32>
    %cst_7 = arith.constant dense<0xFF800000> : vector<16xf32>
    %9 = vector.multi_reduction <maximumf>, %8, %cst_7 [1] : vector<16x8xf32> to vector<16xf32>
    %10 = vector.shape_cast %9 : vector<16xf32> to vector<16x1xf32>
    %11 = vector.broadcast %10 : vector<16x1xf32> to vector<16x8xf32>
    %12 = arith.subf %8, %11 : vector<16x8xf32>
    %13 = math.exp %12 : vector<16x8xf32>
    %cst_8 = arith.constant dense<0.000000e+00> : vector<16xf32>
    %14 = vector.multi_reduction <add>, %13, %cst_8 [1] : vector<16x8xf32> to vector<16xf32>
    %15 = vector.shape_cast %14 : vector<16xf32> to vector<16x1xf32>
    %16 = tpu.reciprocal %15 {approx = true} : vector<16x1xf32> -> vector<16x1xf32>
    %17 = vector.broadcast %16 : vector<16x1xf32> to vector<16x8xf32>
    %18 = arith.mulf %13, %17 : vector<16x8xf32>
    %cst_9 = arith.constant dense<0.000000e+00> : vector<16x8xf32>
    %19 = tpu.matmul %18, %7, %cst_9 {dimension_numbers = #tpu.dot_dimension_numbers<[1], [0], [0], [1], [0, 0, 1, 1], [], []>} : vector<16x8xf32>, vector<8x8xf32>, vector<16x8xf32> -> vector<16x8xf32>
    %c0_10 = arith.constant 0 : index
    %c0_11 = arith.constant 0 : index
    %c0_12 = arith.constant 0 : index
    %20 = vector.load %arg3[%c0_10, %c0_11, %c0_12] : memref<1x16x32xf32, #tpu.memory_space<vmem>>, vector<1x16x8xf32>
    %21 = vector.shape_cast %20 : vector<1x16x8xf32> to vector<16x8xf32>
    %22 = vector.shape_cast %19 : vector<16x8xf32> to vector<1x16x8xf32>
    tpu.vector_store %arg3[%c0_10, %c0_11, %c0_12], %22 {strides = array<i32>} : memref<1x16x32xf32, #tpu.memory_space<vmem>>, vector<1x16x8xf32>,
    %c0_13 = arith.constant 0 : index
    %c0_14 = arith.constant 0 : index
    %c0_15 = arith.constant 0 : index
    %23 = vector.load %arg2[%c0_13, %c0_14, %c0_15] : memref<1x8x96xf32, #tpu.memory_space<vmem>>, vector<1x8x8xf32>
    %24 = vector.shape_cast %23 : vector<1x8x8xf32> to vector<8x8xf32>
    %cst_16 = arith.constant 0.353553385 : f32
    %25 = vector.broadcast %cst_16 : f32 to vector<8x8xf32>
    %26 = arith.mulf %24, %25 : vector<8x8xf32>
    %c0_17 = arith.constant 0 : index
    %c0_18 = arith.constant 0 : index
    %c32_19 = arith.constant 32 : index
    %27 = vector.load %arg1[%c0_17, %c0_18, %c32_19] : memref<1x16x96xf32, #tpu.memory_space<vmem>>, vector<1x16x8xf32>
    %28 = vector.shape_cast %27 : vector<1x16x8xf32> to vector<16x8xf32>
    %c0_20 = arith.constant 0 : index
    %c0_21 = arith.constant 0 : index
    %c64_22 = arith.constant 64 : index
    %29 = vector.load %arg1[%c0_20, %c0_21, %c64_22] : memref<1x16x96xf32, #tpu.memory_space<vmem>>, vector<1x16x8xf32>
    %30 = vector.shape_cast %29 : vector<1x16x8xf32> to vector<16x8xf32>
    %cst_23 = arith.constant dense<0.000000e+00> : vector<8x16xf32>
    %31 = tpu.matmul %26, %28, %cst_23 {dimension_numbers = #tpu.dot_dimension_numbers<[1], [1], [0], [0], [0, 0, 1, 0], [], []>} : vector<8x8xf32>, vector<16x8xf32>, vector<8x16xf32> -> vector<8x16xf32>
    %cst_24 = arith.constant dense<0xFF800000> : vector<8xf32>
    %32 = vector.multi_reduction <maximumf>, %31, %cst_24 [1] : vector<8x16xf32> to vector<8xf32>
    %33 = vector.shape_cast %32 : vector<8xf32> to vector<8x1xf32>
    %34 = vector.broadcast %33 : vector<8x1xf32> to vector<8x16xf32>
    %35 = arith.subf %31, %34 : vector<8x16xf32>
    %36 = math.exp %35 : vector<8x16xf32>
    %cst_25 = arith.constant dense<0.000000e+00> : vector<8xf32>
    %37 = vector.multi_reduction <add>, %36, %cst_25 [1] : vector<8x16xf32> to vector<8xf32>
    %38 = vector.shape_cast %37 : vector<8xf32> to vector<8x1xf32>
    %39 = tpu.reciprocal %38 {approx = true} : vector<8x1xf32> -> vector<8x1xf32>
    %40 = vector.broadcast %39 : vector<8x1xf32> to vector<8x16xf32>
    %41 = arith.mulf %36, %40 : vector<8x16xf32>
    %cst_26 = arith.constant dense<0.000000e+00> : vector<8x8xf32>
    %42 = tpu.matmul %41, %30, %cst_26 {dimension_numbers = #tpu.dot_dimension_numbers<[1], [0], [0], [1], [0, 0, 1, 1], [], []>} : vector<8x16xf32>, vector<16x8xf32>, vector<8x8xf32> -> vector<8x8xf32>
    %c0_27 = arith.constant 0 : index
    %c0_28 = arith.constant 0 : index
    %c0_29 = arith.constant 0 : index
    %43 = vector.load %arg4[%c0_27, %c0_28, %c0_29] : memref<1x8x32xf32, #tpu.memory_space<vmem>>, vector<1x8x8xf32>
    %44 = vector.shape_cast %43 : vector<1x8x8xf32> to vector<8x8xf32>
    %45 = vector.shape_cast %42 : vector<8x8xf32> to vector<1x8x8xf32>
    tpu.vector_store %arg4[%c0_27, %c0_28, %c0_29], %45 {strides = array<i32>} : memref<1x8x32xf32, #tpu.memory_space<vmem>>, vector<1x8x8xf32>,
    %c0_30 = arith.constant 0 : index
    %c0_31 = arith.constant 0 : index
    %c8 = arith.constant 8 : index
    %46 = vector.load %arg1[%c0_30, %c0_31, %c8] : memref<1x16x96xf32, #tpu.memory_space<vmem>>, vector<1x16x8xf32>
    %47 = vector.shape_cast %46 : vector<1x16x8xf32> to vector<16x8xf32>
    %cst_32 = arith.constant 0.353553385 : f32
    %48 = vector.broadcast %cst_32 : f32 to vector<16x8xf32>
    %49 = arith.mulf %47, %48 : vector<16x8xf32>
    %c0_33 = arith.constant 0 : index
    %c0_34 = arith.constant 0 : index
    %c40 = arith.constant 40 : index
    %50 = vector.load %arg2[%c0_33, %c0_34, %c40] : memref<1x8x96xf32, #tpu.memory_space<vmem>>, vector<1x8x8xf32>
    %51 = vector.shape_cast %50 : vector<1x8x8xf32> to vector<8x8xf32>
    %c0_35 = arith.constant 0 : index
    %c0_36 = arith.constant 0 : index
    %c72 = arith.constant 72 : index
    %52 = vector.load %arg2[%c0_35, %c0_36, %c72] : memref<1x8x96xf32, #tpu.memory_space<vmem>>, vector<1x8x8xf32>
    %53 = vector.shape_cast %52 : vector<1x8x8xf32> to vector<8x8xf32>
    %cst_37 = arith.constant dense<0.000000e+00> : vector<16x8xf32>
    %54 = tpu.matmul %49, %51, %cst_37 {dimension_numbers = #tpu.dot_dimension_numbers<[1], [1], [0], [0], [0, 0, 1, 0], [], []>} : vector<16x8xf32>, vector<8x8xf32>, vector<16x8xf32> -> vector<16x8xf32>
    %cst_38 = arith.constant dense<0xFF800000> : vector<16xf32>
    %55 = vector.multi_reduction <maximumf>, %54, %cst_38 [1] : vector<16x8xf32> to vector<16xf32>
    %56 = vector.shape_cast %55 : vector<16xf32> to vector<16x1xf32>
    %57 = vector.broadcast %56 : vector<16x1xf32> to vector<16x8xf32>
    %58 = arith.subf %54, %57 : vector<16x8xf32>
    %59 = math.exp %58 : vector<16x8xf32>
    %cst_39 = arith.constant dense<0.000000e+00> : vector<16xf32>
    %60 = vector.multi_reduction <add>, %59, %cst_39 [1] : vector<16x8xf32> to vector<16xf32>
    %61 = vector.shape_cast %60 : vector<16xf32> to vector<16x1xf32>
    %62 = tpu.reciprocal %61 {approx = true} : vector<16x1xf32> -> vector<16x1xf32>
    %63 = vector.broadcast %62 : vector<16x1xf32> to vector<16x8xf32>
    %64 = arith.mulf %59, %63 : vector<16x8xf32>
    %cst_40 = arith.constant dense<0.000000e+00> : vector<16x8xf32>
    %65 = tpu.matmul %64, %53, %cst_40 {dimension_numbers = #tpu.dot_dimension_numbers<[1], [0], [0], [1], [0, 0, 1, 1], [], []>} : vector<16x8xf32>, vector<8x8xf32>, vector<16x8xf32> -> vector<16x8xf32>
    %c0_41 = arith.constant 0 : index
    %c0_42 = arith.constant 0 : index
    %c8_43 = arith.constant 8 : index
    %66 = vector.load %arg3[%c0_41, %c0_42, %c8_43] : memref<1x16x32xf32, #tpu.memory_space<vmem>>, vector<1x16x8xf32>
    %67 = vector.shape_cast %66 : vector<1x16x8xf32> to vector<16x8xf32>
    %68 = vector.shape_cast %65 : vector<16x8xf32> to vector<1x16x8xf32>
    tpu.vector_store %arg3[%c0_41, %c0_42, %c8_43], %68 {strides = array<i32>} : memref<1x16x32xf32, #tpu.memory_space<vmem>>, vector<1x16x8xf32>,
    %c0_44 = arith.constant 0 : index
    %c0_45 = arith.constant 0 : index
    %c8_46 = arith.constant 8 : index
    %69 = vector.load %arg2[%c0_44, %c0_45, %c8_46] : memref<1x8x96xf32, #tpu.memory_space<vmem>>, vector<1x8x8xf32>
    %70 = vector.shape_cast %69 : vector<1x8x8xf32> to vector<8x8xf32>
    %cst_47 = arith.constant 0.353553385 : f32
    %71 = vector.broadcast %cst_47 : f32 to vector<8x8xf32>
    %72 = arith.mulf %70, %71 : vector<8x8xf32>
    %c0_48 = arith.constant 0 : index
    %c0_49 = arith.constant 0 : index
    %c40_50 = arith.constant 40 : index
    %73 = vector.load %arg1[%c0_48, %c0_49, %c40_50] : memref<1x16x96xf32, #tpu.memory_space<vmem>>, vector<1x16x8xf32>
    %74 = vector.shape_cast %73 : vector<1x16x8xf32> to vector<16x8xf32>
    %c0_51 = arith.constant 0 : index
    %c0_52 = arith.constant 0 : index
    %c72_53 = arith.constant 72 : index
    %75 = vector.load %arg1[%c0_51, %c0_52, %c72_53] : memref<1x16x96xf32, #tpu.memory_space<vmem>>, vector<1x16x8xf32>
    %76 = vector.shape_cast %75 : vector<1x16x8xf32> to vector<16x8xf32>
    %cst_54 = arith.constant dense<0.000000e+00> : vector<8x16xf32>
    %77 = tpu.matmul %72, %74, %cst_54 {dimension_numbers = #tpu.dot_dimension_numbers<[1], [1], [0], [0], [0, 0, 1, 0], [], []>} : vector<8x8xf32>, vector<16x8xf32>, vector<8x16xf32> -> vector<8x16xf32>
    %cst_55 = arith.constant dense<0xFF800000> : vector<8xf32>
    %78 = vector.multi_reduction <maximumf>, %77, %cst_55 [1] : vector<8x16xf32> to vector<8xf32>
    %79 = vector.shape_cast %78 : vector<8xf32> to vector<8x1xf32>
    %80 = vector.broadcast %79 : vector<8x1xf32> to vector<8x16xf32>
    %81 = arith.subf %77, %80 : vector<8x16xf32>
    %82 = math.exp %81 : vector<8x16xf32>
    %cst_56 = arith.constant dense<0.000000e+00> : vector<8xf32>
    %83 = vector.multi_reduction <add>, %82, %cst_56 [1] : vector<8x16xf32> to vector<8xf32>
    %84 = vector.shape_cast %83 : vector<8xf32> to vector<8x1xf32>
    %85 = tpu.reciprocal %84 {approx = true} : vector<8x1xf32> -> vector<8x1xf32>
    %86 = vector.broadcast %85 : vector<8x1xf32> to vector<8x16xf32>
    %87 = arith.mulf %82, %86 : vector<8x16xf32>
    %cst_57 = arith.constant dense<0.000000e+00> : vector<8x8xf32>
    %88 = tpu.matmul %87, %76, %cst_57 {dimension_numbers = #tpu.dot_dimension_numbers<[1], [0], [0], [1], [0, 0, 1, 1], [], []>} : vector<8x16xf32>, vector<16x8xf32>, vector<8x8xf32> -> vector<8x8xf32>
    %c0_58 = arith.constant 0 : index
    %c0_59 = arith.constant 0 : index
    %c8_60 = arith.constant 8 : index
    %89 = vector.load %arg4[%c0_58, %c0_59, %c8_60] : memref<1x8x32xf32, #tpu.memory_space<vmem>>, vector<1x8x8xf32>
    %90 = vector.shape_cast %89 : vector<1x8x8xf32> to vector<8x8xf32>
    %91 = vector.shape_cast %88 : vector<8x8xf32> to vector<1x8x8xf32>
    tpu.vector_store %arg4[%c0_58, %c0_59, %c8_60], %91 {strides = array<i32>} : memref<1x8x32xf32, #tpu.memory_space<vmem>>, vector<1x8x8xf32>,
    %c0_61 = arith.constant 0 : index
    %c0_62 = arith.constant 0 : index
    %c16 = arith.constant 16 : index
    %92 = vector.load %arg1[%c0_61, %c0_62, %c16] : memref<1x16x96xf32, #tpu.memory_space<vmem>>, vector<1x16x8xf32>
    %93 = vector.shape_cast %92 : vector<1x16x8xf32> to vector<16x8xf32>
    %cst_63 = arith.constant 0.353553385 : f32
    %94 = vector.broadcast %cst_63 : f32 to vector<16x8xf32>
    %95 = arith.mulf %93, %94 : vector<16x8xf32>
    %c0_64 = arith.constant 0 : index
    %c0_65 = arith.constant 0 : index
    %c48 = arith.constant 48 : index
    %96 = vector.load %arg2[%c0_64, %c0_65, %c48] : memref<1x8x96xf32, #tpu.memory_space<vmem>>, vector<1x8x8xf32>
    %97 = vector.shape_cast %96 : vector<1x8x8xf32> to vector<8x8xf32>
    %c0_66 = arith.constant 0 : index
    %c0_67 = arith.constant 0 : index
    %c80 = arith.constant 80 : index
    %98 = vector.load %arg2[%c0_66, %c0_67, %c80] : memref<1x8x96xf32, #tpu.memory_space<vmem>>, vector<1x8x8xf32>
    %99 = vector.shape_cast %98 : vector<1x8x8xf32> to vector<8x8xf32>
    %cst_68 = arith.constant dense<0.000000e+00> : vector<16x8xf32>
    %100 = tpu.matmul %95, %97, %cst_68 {dimension_numbers = #tpu.dot_dimension_numbers<[1], [1], [0], [0], [0, 0, 1, 0], [], []>} : vector<16x8xf32>, vector<8x8xf32>, vector<16x8xf32> -> vector<16x8xf32>
    %cst_69 = arith.constant dense<0xFF800000> : vector<16xf32>
    %101 = vector.multi_reduction <maximumf>, %100, %cst_69 [1] : vector<16x8xf32> to vector<16xf32>
    %102 = vector.shape_cast %101 : vector<16xf32> to vector<16x1xf32>
    %103 = vector.broadcast %102 : vector<16x1xf32> to vector<16x8xf32>
    %104 = arith.subf %100, %103 : vector<16x8xf32>
    %105 = math.exp %104 : vector<16x8xf32>
    %cst_70 = arith.constant dense<0.000000e+00> : vector<16xf32>
    %106 = vector.multi_reduction <add>, %105, %cst_70 [1] : vector<16x8xf32> to vector<16xf32>
    %107 = vector.shape_cast %106 : vector<16xf32> to vector<16x1xf32>
    %108 = tpu.reciprocal %107 {approx = true} : vector<16x1xf32> -> vector<16x1xf32>
    %109 = vector.broadcast %108 : vector<16x1xf32> to vector<16x8xf32>
    %110 = arith.mulf %105, %109 : vector<16x8xf32>
    %cst_71 = arith.constant dense<0.000000e+00> : vector<16x8xf32>
    %111 = tpu.matmul %110, %99, %cst_71 {dimension_numbers = #tpu.dot_dimension_numbers<[1], [0], [0], [1], [0, 0, 1, 1], [], []>} : vector<16x8xf32>, vector<8x8xf32>, vector<16x8xf32> -> vector<16x8xf32>
    %c0_72 = arith.constant 0 : index
    %c0_73 = arith.constant 0 : index
    %c16_74 = arith.constant 16 : index
    %112 = vector.load %arg3[%c0_72, %c0_73, %c16_74] : memref<1x16x32xf32, #tpu.memory_space<vmem>>, vector<1x16x8xf32>
    %113 = vector.shape_cast %112 : vector<1x16x8xf32> to vector<16x8xf32>
    %114 = vector.shape_cast %111 : vector<16x8xf32> to vector<1x16x8xf32>
    tpu.vector_store %arg3[%c0_72, %c0_73, %c16_74], %114 {strides = array<i32>} : memref<1x16x32xf32, #tpu.memory_space<vmem>>, vector<1x16x8xf32>,
    %c0_75 = arith.constant 0 : index
    %c0_76 = arith.constant 0 : index
    %c16_77 = arith.constant 16 : index
    %115 = vector.load %arg2[%c0_75, %c0_76, %c16_77] : memref<1x8x96xf32, #tpu.memory_space<vmem>>, vector<1x8x8xf32>
    %116 = vector.shape_cast %115 : vector<1x8x8xf32> to vector<8x8xf32>
    %cst_78 = arith.constant 0.353553385 : f32
    %117 = vector.broadcast %cst_78 : f32 to vector<8x8xf32>
    %118 = arith.mulf %116, %117 : vector<8x8xf32>
    %c0_79 = arith.constant 0 : index
    %c0_80 = arith.constant 0 : index
    %c48_81 = arith.constant 48 : index
    %119 = vector.load %arg1[%c0_79, %c0_80, %c48_81] : memref<1x16x96xf32, #tpu.memory_space<vmem>>, vector<1x16x8xf32>
    %120 = vector.shape_cast %119 : vector<1x16x8xf32> to vector<16x8xf32>
    %c0_82 = arith.constant 0 : index
    %c0_83 = arith.constant 0 : index
    %c80_84 = arith.constant 80 : index
    %121 = vector.load %arg1[%c0_82, %c0_83, %c80_84] : memref<1x16x96xf32, #tpu.memory_space<vmem>>, vector<1x16x8xf32>
    %122 = vector.shape_cast %121 : vector<1x16x8xf32> to vector<16x8xf32>
    %cst_85 = arith.constant dense<0.000000e+00> : vector<8x16xf32>
    %123 = tpu.matmul %118, %120, %cst_85 {dimension_numbers = #tpu.dot_dimension_numbers<[1], [1], [0], [0], [0, 0, 1, 0], [], []>} : vector<8x8xf32>, vector<16x8xf32>, vector<8x16xf32> -> vector<8x16xf32>
    %cst_86 = arith.constant dense<0xFF800000> : vector<8xf32>
    %124 = vector.multi_reduction <maximumf>, %123, %cst_86 [1] : vector<8x16xf32> to vector<8xf32>
    %125 = vector.shape_cast %124 : vector<8xf32> to vector<8x1xf32>
    %126 = vector.broadcast %125 : vector<8x1xf32> to vector<8x16xf32>
    %127 = arith.subf %123, %126 : vector<8x16xf32>
    %128 = math.exp %127 : vector<8x16xf32>
    %cst_87 = arith.constant dense<0.000000e+00> : vector<8xf32>
    %129 = vector.multi_reduction <add>, %128, %cst_87 [1] : vector<8x16xf32> to vector<8xf32>
    %130 = vector.shape_cast %129 : vector<8xf32> to vector<8x1xf32>
    %131 = tpu.reciprocal %130 {approx = true} : vector<8x1xf32> -> vector<8x1xf32>
    %132 = vector.broadcast %131 : vector<8x1xf32> to vector<8x16xf32>
    %133 = arith.mulf %128, %132 : vector<8x16xf32>
    %cst_88 = arith.constant dense<0.000000e+00> : vector<8x8xf32>
    %134 = tpu.matmul %133, %122, %cst_88 {dimension_numbers = #tpu.dot_dimension_numbers<[1], [0], [0], [1], [0, 0, 1, 1], [], []>} : vector<8x16xf32>, vector<16x8xf32>, vector<8x8xf32> -> vector<8x8xf32>
    %c0_89 = arith.constant 0 : index
    %c0_90 = arith.constant 0 : index
    %c16_91 = arith.constant 16 : index
    %135 = vector.load %arg4[%c0_89, %c0_90, %c16_91] : memref<1x8x32xf32, #tpu.memory_space<vmem>>, vector<1x8x8xf32>
    %136 = vector.shape_cast %135 : vector<1x8x8xf32> to vector<8x8xf32>
    %137 = vector.shape_cast %134 : vector<8x8xf32> to vector<1x8x8xf32>
    tpu.vector_store %arg4[%c0_89, %c0_90, %c16_91], %137 {strides = array<i32>} : memref<1x8x32xf32, #tpu.memory_space<vmem>>, vector<1x8x8xf32>,
    %c0_92 = arith.constant 0 : index
    %c0_93 = arith.constant 0 : index
    %c24 = arith.constant 24 : index
    %138 = vector.load %arg1[%c0_92, %c0_93, %c24] : memref<1x16x96xf32, #tpu.memory_space<vmem>>, vector<1x16x8xf32>
    %139 = vector.shape_cast %138 : vector<1x16x8xf32> to vector<16x8xf32>
    %cst_94 = arith.constant 0.353553385 : f32
    %140 = vector.broadcast %cst_94 : f32 to vector<16x8xf32>
    %141 = arith.mulf %139, %140 : vector<16x8xf32>
    %c0_95 = arith.constant 0 : index
    %c0_96 = arith.constant 0 : index
    %c56 = arith.constant 56 : index
    %142 = vector.load %arg2[%c0_95, %c0_96, %c56] : memref<1x8x96xf32, #tpu.memory_space<vmem>>, vector<1x8x8xf32>
    %143 = vector.shape_cast %142 : vector<1x8x8xf32> to vector<8x8xf32>
    %c0_97 = arith.constant 0 : index
    %c0_98 = arith.constant 0 : index
    %c88 = arith.constant 88 : index
    %144 = vector.load %arg2[%c0_97, %c0_98, %c88] : memref<1x8x96xf32, #tpu.memory_space<vmem>>, vector<1x8x8xf32>
    %145 = vector.shape_cast %144 : vector<1x8x8xf32> to vector<8x8xf32>
    %cst_99 = arith.constant dense<0.000000e+00> : vector<16x8xf32>
    %146 = tpu.matmul %141, %143, %cst_99 {dimension_numbers = #tpu.dot_dimension_numbers<[1], [1], [0], [0], [0, 0, 1, 0], [], []>} : vector<16x8xf32>, vector<8x8xf32>, vector<16x8xf32> -> vector<16x8xf32>
    %cst_100 = arith.constant dense<0xFF800000> : vector<16xf32>
    %147 = vector.multi_reduction <maximumf>, %146, %cst_100 [1] : vector<16x8xf32> to vector<16xf32>
    %148 = vector.shape_cast %147 : vector<16xf32> to vector<16x1xf32>
    %149 = vector.broadcast %148 : vector<16x1xf32> to vector<16x8xf32>
    %150 = arith.subf %146, %149 : vector<16x8xf32>
    %151 = math.exp %150 : vector<16x8xf32>
    %cst_101 = arith.constant dense<0.000000e+00> : vector<16xf32>
    %152 = vector.multi_reduction <add>, %151, %cst_101 [1] : vector<16x8xf32> to vector<16xf32>
    %153 = vector.shape_cast %152 : vector<16xf32> to vector<16x1xf32>
    %154 = tpu.reciprocal %153 {approx = true} : vector<16x1xf32> -> vector<16x1xf32>
    %155 = vector.broadcast %154 : vector<16x1xf32> to vector<16x8xf32>
    %156 = arith.mulf %151, %155 : vector<16x8xf32>
    %cst_102 = arith.constant dense<0.000000e+00> : vector<16x8xf32>
    %157 = tpu.matmul %156, %145, %cst_102 {dimension_numbers = #tpu.dot_dimension_numbers<[1], [0], [0], [1], [0, 0, 1, 1], [], []>} : vector<16x8xf32>, vector<8x8xf32>, vector<16x8xf32> -> vector<16x8xf32>
    %c0_103 = arith.constant 0 : index
    %c0_104 = arith.constant 0 : index
    %c24_105 = arith.constant 24 : index
    %158 = vector.load %arg3[%c0_103, %c0_104, %c24_105] : memref<1x16x32xf32, #tpu.memory_space<vmem>>, vector<1x16x8xf32>
    %159 = vector.shape_cast %158 : vector<1x16x8xf32> to vector<16x8xf32>
    %160 = vector.shape_cast %157 : vector<16x8xf32> to vector<1x16x8xf32>
    tpu.vector_store %arg3[%c0_103, %c0_104, %c24_105], %160 {strides = array<i32>} : memref<1x16x32xf32, #tpu.memory_space<vmem>>, vector<1x16x8xf32>,
    %c0_106 = arith.constant 0 : index
    %c0_107 = arith.constant 0 : index
    %c24_108 = arith.constant 24 : index
    %161 = vector.load %arg2[%c0_106, %c0_107, %c24_108] : memref<1x8x96xf32, #tpu.memory_space<vmem>>, vector<1x8x8xf32>
    %162 = vector.shape_cast %161 : vector<1x8x8xf32> to vector<8x8xf32>
    %cst_109 = arith.constant 0.353553385 : f32
    %163 = vector.broadcast %cst_109 : f32 to vector<8x8xf32>
    %164 = arith.mulf %162, %163 : vector<8x8xf32>
    %c0_110 = arith.constant 0 : index
    %c0_111 = arith.constant 0 : index
    %c56_112 = arith.constant 56 : index
    %165 = vector.load %arg1[%c0_110, %c0_111, %c56_112] : memref<1x16x96xf32, #tpu.memory_space<vmem>>, vector<1x16x8xf32>
    %166 = vector.shape_cast %165 : vector<1x16x8xf32> to vector<16x8xf32>
    %c0_113 = arith.constant 0 : index
    %c0_114 = arith.constant 0 : index
    %c88_115 = arith.constant 88 : index
    %167 = vector.load %arg1[%c0_113, %c0_114, %c88_115] : memref<1x16x96xf32, #tpu.memory_space<vmem>>, vector<1x16x8xf32>
    %168 = vector.shape_cast %167 : vector<1x16x8xf32> to vector<16x8xf32>
    %cst_116 = arith.constant dense<0.000000e+00> : vector<8x16xf32>
    %169 = tpu.matmul %164, %166, %cst_116 {dimension_numbers = #tpu.dot_dimension_numbers<[1], [1], [0], [0], [0, 0, 1, 0], [], []>} : vector<8x8xf32>, vector<16x8xf32>, vector<8x16xf32> -> vector<8x16xf32>
    %cst_117 = arith.constant dense<0xFF800000> : vector<8xf32>
    %170 = vector.multi_reduction <maximumf>, %169, %cst_117 [1] : vector<8x16xf32> to vector<8xf32>
    %171 = vector.shape_cast %170 : vector<8xf32> to vector<8x1xf32>
    %172 = vector.broadcast %171 : vector<8x1xf32> to vector<8x16xf32>
    %173 = arith.subf %169, %172 : vector<8x16xf32>
    %174 = math.exp %173 : vector<8x16xf32>
    %cst_118 = arith.constant dense<0.000000e+00> : vector<8xf32>
    %175 = vector.multi_reduction <add>, %174, %cst_118 [1] : vector<8x16xf32> to vector<8xf32>
    %176 = vector.shape_cast %175 : vector<8xf32> to vector<8x1xf32>
    %177 = tpu.reciprocal %176 {approx = true} : vector<8x1xf32> -> vector<8x1xf32>
    %178 = vector.broadcast %177 : vector<8x1xf32> to vector<8x16xf32>
    %179 = arith.mulf %174, %178 : vector<8x16xf32>
    %cst_119 = arith.constant dense<0.000000e+00> : vector<8x8xf32>
    %180 = tpu.matmul %179, %168, %cst_119 {dimension_numbers = #tpu.dot_dimension_numbers<[1], [0], [0], [1], [0, 0, 1, 1], [], []>} : vector<8x16xf32>, vector<16x8xf32>, vector<8x8xf32> -> vector<8x8xf32>
    %c0_120 = arith.constant 0 : index
    %c0_121 = arith.constant 0 : index
    %c24_122 = arith.constant 24 : index
    %181 = vector.load %arg4[%c0_120, %c0_121, %c24_122] : memref<1x8x32xf32, #tpu.memory_space<vmem>>, vector<1x8x8xf32>
    %182 = vector.shape_cast %181 : vector<1x8x8xf32> to vector<8x8xf32>
    %183 = vector.shape_cast %180 : vector<8x8xf32> to vector<1x8x8xf32>
    tpu.vector_store %arg4[%c0_120, %c0_121, %c24_122], %183 {strides = array<i32>} : memref<1x8x32xf32, #tpu.memory_space<vmem>>, vector<1x8x8xf32>,
    return
  }
  func.func @transform_0(%arg0: i32) -> (i32, i32, i32) {
    %c0_i32 = arith.constant 0 : i32
    %c0_i32_0 = arith.constant 0 : i32
    %c0_i32_1 = arith.constant 0 : i32
    return %arg0, %c0_i32, %c0_i32_0 : i32, i32, i32
  }
  func.func @transform_1(%arg0: i32) -> (i32, i32, i32) {
    %c0_i32 = arith.constant 0 : i32
    %c0_i32_0 = arith.constant 0 : i32
    %c0_i32_1 = arith.constant 0 : i32
    return %arg0, %c0_i32, %c0_i32_0 : i32, i32, i32
  }
  func.func @transform_2(%arg0: i32) -> (i32, i32, i32) {
    %c0_i32 = arith.constant 0 : i32
    %c0_i32_0 = arith.constant 0 : i32
    %c0_i32_1 = arith.constant 0 : i32
    return %arg0, %c0_i32, %c0_i32_0 : i32, i32, i32
  }
  func.func @transform_3(%arg0: i32) -> (i32, i32, i32) {
    %c0_i32 = arith.constant 0 : i32
    %c0_i32_0 = arith.constant 0 : i32
    %c0_i32_1 = arith.constant 0 : i32
    return %arg0, %c0_i32, %c0_i32_0 : i32, i32, i32
  }
}

module attributes {stable_mosaic.version = 11 : i64} {
  func.func @_linear_kernel(%arg0: i32, %arg1: i32, %arg2: i32, %arg3: memref<16x32xf32, #tpu.memory_space<vmem>>, %arg4: memref<32x96xf32, #tpu.memory_space<vmem>>, %arg5: memref<1x96xf32, #tpu.memory_space<vmem>>, %arg6: memref<16x96xf32, #tpu.memory_space<vmem>>, %arg7: memref<16x96xf32, #tpu.memory_space<vmem>>) attributes {dimension_semantics = [#tpu.dimension_semantics<parallel>, #tpu.dimension_semantics<parallel>, #tpu.dimension_semantics<arbitrary>], iteration_bounds = array<i64: 1, 1, 1>, scalar_prefetch = 0 : i64, scratch_operands = 1 : i64, tpu.core_type = #tpu.core_type<tc>, window_params = [{transform_indices = @transform_0, window_bounds = array<i64: 16, 32>}, {transform_indices = @transform_1, window_bounds = array<i64: 32, 96>}, {transform_indices = @transform_2, window_bounds = array<i64: 1, 96>}, {transform_indices = @transform_3, window_bounds = array<i64: 16, 96>}]} {
    %c0_i32 = arith.constant 0 : i32
    %0 = arith.cmpi eq, %arg2, %c0_i32 : i32
    %1 = arith.extui %0 : i1 to i32
    %c0_i32_0 = arith.constant 0 : i32
    %2 = arith.cmpi ne, %1, %c0_i32_0 : i32
    scf.if %2 {
      %cst_10 = arith.constant 0.000000e+00 : f32
      %12 = vector.broadcast %cst_10 : f32 to vector<16x96xf32>
      %c0_11 = arith.constant 0 : index
      %c0_12 = arith.constant 0 : index
      %13 = vector.load %arg7[%c0_11, %c0_12] : memref<16x96xf32, #tpu.memory_space<vmem>>, vector<16x96xf32>
      tpu.vector_store %arg7[%c0_11, %c0_12], %12 {strides = array<i32>} : memref<16x96xf32, #tpu.memory_space<vmem>>, vector<16x96xf32>,
    } else {
    }
    %c0 = arith.constant 0 : index
    %c0_1 = arith.constant 0 : index
    %3 = vector.load %arg7[%c0, %c0_1] : memref<16x96xf32, #tpu.memory_space<vmem>>, vector<16x96xf32>
    %c0_2 = arith.constant 0 : index
    %c0_3 = arith.constant 0 : index
    %4 = vector.load %arg3[%c0_2, %c0_3] : memref<16x32xf32, #tpu.memory_space<vmem>>, vector<16x32xf32>
    %c0_4 = arith.constant 0 : index
    %c0_5 = arith.constant 0 : index
    %5 = vector.load %arg4[%c0_4, %c0_5] : memref<32x96xf32, #tpu.memory_space<vmem>>, vector<32x96xf32>
    %cst = arith.constant dense<0.000000e+00> : vector<16x96xf32>
    %6 = tpu.matmul %4, %5, %cst {dimension_numbers = #tpu.dot_dimension_numbers<[1], [0], [0], [1], [0, 0, 1, 1], [], []>} : vector<16x32xf32>, vector<32x96xf32>, vector<16x96xf32> -> vector<16x96xf32>
    %7 = arith.addf %3, %6 : vector<16x96xf32>
    %c0_6 = arith.constant 0 : index
    %c0_7 = arith.constant 0 : index
    %8 = vector.load %arg7[%c0_6, %c0_7] : memref<16x96xf32, #tpu.memory_space<vmem>>, vector<16x96xf32>
    tpu.vector_store %arg7[%c0_6, %c0_7], %7 {strides = array<i32>} : memref<16x96xf32, #tpu.memory_space<vmem>>, vector<16x96xf32>,
    %c0_i32_8 = arith.constant 0 : i32
    %9 = arith.cmpi eq, %arg2, %c0_i32_8 : i32
    %10 = arith.extui %9 : i1 to i32
    %c0_i32_9 = arith.constant 0 : i32
    %11 = arith.cmpi ne, %10, %c0_i32_9 : i32
    scf.if %11 {
      %c0_10 = arith.constant 0 : index
      %c0_11 = arith.constant 0 : index
      %12 = vector.load %arg7[%c0_10, %c0_11] : memref<16x96xf32, #tpu.memory_space<vmem>>, vector<16x96xf32>
      %c0_12 = arith.constant 0 : index
      %c0_13 = arith.constant 0 : index
      %13 = vector.load %arg5[%c0_12, %c0_13] : memref<1x96xf32, #tpu.memory_space<vmem>>, vector<1x96xf32>
      %14 = vector.broadcast %13 : vector<1x96xf32> to vector<16x96xf32>
      %15 = arith.addf %12, %14 : vector<16x96xf32>
      %c0_14 = arith.constant 0 : index
      %c0_15 = arith.constant 0 : index
      %16 = vector.load %arg6[%c0_14, %c0_15] : memref<16x96xf32, #tpu.memory_space<vmem>>, vector<16x96xf32>
      tpu.vector_store %arg6[%c0_14, %c0_15], %15 {strides = array<i32>} : memref<16x96xf32, #tpu.memory_space<vmem>>, vector<16x96xf32>,
    } else {
    }
    return
  }
  func.func @transform_0(%arg0: i32, %arg1: i32, %arg2: i32) -> (i32, i32) {
    %c0_i32 = arith.constant 0 : i32
    return %arg0, %arg2 : i32, i32
  }
  func.func @transform_1(%arg0: i32, %arg1: i32, %arg2: i32) -> (i32, i32) {
    %c0_i32 = arith.constant 0 : i32
    return %arg2, %arg1 : i32, i32
  }
  func.func @transform_2(%arg0: i32, %arg1: i32, %arg2: i32) -> (i32, i32) {
    %c0_i32 = arith.constant 0 : i32
    %c0_i32_0 = arith.constant 0 : i32
    return %c0_i32, %arg1 : i32, i32
  }
  func.func @transform_3(%arg0: i32, %arg1: i32, %arg2: i32) -> (i32, i32) {
    %c0_i32 = arith.constant 0 : i32
    return %arg0, %arg1 : i32, i32
  }
}

module attributes {stable_mosaic.version = 11 : i64} {
  func.func @_linear_kernel(%arg0: i32, %arg1: i32, %arg2: i32, %arg3: memref<32x32xf32, #tpu.memory_space<vmem>>, %arg4: memref<32x96xf32, #tpu.memory_space<vmem>>, %arg5: memref<1x96xf32, #tpu.memory_space<vmem>>, %arg6: memref<32x96xf32, #tpu.memory_space<vmem>>, %arg7: memref<32x96xf32, #tpu.memory_space<vmem>>) attributes {dimension_semantics = [#tpu.dimension_semantics<parallel>, #tpu.dimension_semantics<parallel>, #tpu.dimension_semantics<arbitrary>], iteration_bounds = array<i64: 1, 1, 1>, scalar_prefetch = 0 : i64, scratch_operands = 1 : i64, tpu.core_type = #tpu.core_type<tc>, window_params = [{transform_indices = @transform_0, window_bounds = array<i64: 32, 32>}, {transform_indices = @transform_1, window_bounds = array<i64: 32, 96>}, {transform_indices = @transform_2, window_bounds = array<i64: 1, 96>}, {transform_indices = @transform_3, window_bounds = array<i64: 32, 96>}]} {
    %c0_i32 = arith.constant 0 : i32
    %0 = arith.cmpi eq, %arg2, %c0_i32 : i32
    %1 = arith.extui %0 : i1 to i32
    %c0_i32_0 = arith.constant 0 : i32
    %2 = arith.cmpi ne, %1, %c0_i32_0 : i32
    scf.if %2 {
      %cst_10 = arith.constant 0.000000e+00 : f32
      %12 = vector.broadcast %cst_10 : f32 to vector<32x96xf32>
      %c0_11 = arith.constant 0 : index
      %c0_12 = arith.constant 0 : index
      %13 = vector.load %arg7[%c0_11, %c0_12] : memref<32x96xf32, #tpu.memory_space<vmem>>, vector<32x96xf32>
      tpu.vector_store %arg7[%c0_11, %c0_12], %12 {strides = array<i32>} : memref<32x96xf32, #tpu.memory_space<vmem>>, vector<32x96xf32>,
    } else {
    }
    %c0 = arith.constant 0 : index
    %c0_1 = arith.constant 0 : index
    %3 = vector.load %arg7[%c0, %c0_1] : memref<32x96xf32, #tpu.memory_space<vmem>>, vector<32x96xf32>
    %c0_2 = arith.constant 0 : index
    %c0_3 = arith.constant 0 : index
    %4 = vector.load %arg3[%c0_2, %c0_3] : memref<32x32xf32, #tpu.memory_space<vmem>>, vector<32x32xf32>
    %c0_4 = arith.constant 0 : index
    %c0_5 = arith.constant 0 : index
    %5 = vector.load %arg4[%c0_4, %c0_5] : memref<32x96xf32, #tpu.memory_space<vmem>>, vector<32x96xf32>
    %cst = arith.constant dense<0.000000e+00> : vector<32x96xf32>
    %6 = tpu.matmul %4, %5, %cst {dimension_numbers = #tpu.dot_dimension_numbers<[1], [0], [0], [1], [0, 0, 1, 1], [], []>} : vector<32x32xf32>, vector<32x96xf32>, vector<32x96xf32> -> vector<32x96xf32>
    %7 = arith.addf %3, %6 : vector<32x96xf32>
    %c0_6 = arith.constant 0 : index
    %c0_7 = arith.constant 0 : index
    %8 = vector.load %arg7[%c0_6, %c0_7] : memref<32x96xf32, #tpu.memory_space<vmem>>, vector<32x96xf32>
    tpu.vector_store %arg7[%c0_6, %c0_7], %7 {strides = array<i32>} : memref<32x96xf32, #tpu.memory_space<vmem>>, vector<32x96xf32>,
    %c0_i32_8 = arith.constant 0 : i32
    %9 = arith.cmpi eq, %arg2, %c0_i32_8 : i32
    %10 = arith.extui %9 : i1 to i32
    %c0_i32_9 = arith.constant 0 : i32
    %11 = arith.cmpi ne, %10, %c0_i32_9 : i32
    scf.if %11 {
      %c0_10 = arith.constant 0 : index
      %c0_11 = arith.constant 0 : index
      %12 = vector.load %arg7[%c0_10, %c0_11] : memref<32x96xf32, #tpu.memory_space<vmem>>, vector<32x96xf32>
      %c0_12 = arith.constant 0 : index
      %c0_13 = arith.constant 0 : index
      %13 = vector.load %arg5[%c0_12, %c0_13] : memref<1x96xf32, #tpu.memory_space<vmem>>, vector<1x96xf32>
      %14 = vector.broadcast %13 : vector<1x96xf32> to vector<32x96xf32>
      %15 = arith.addf %12, %14 : vector<32x96xf32>
      %c0_14 = arith.constant 0 : index
      %c0_15 = arith.constant 0 : index
      %16 = vector.load %arg6[%c0_14, %c0_15] : memref<32x96xf32, #tpu.memory_space<vmem>>, vector<32x96xf32>
      tpu.vector_store %arg6[%c0_14, %c0_15], %15 {strides = array<i32>} : memref<32x96xf32, #tpu.memory_space<vmem>>, vector<32x96xf32>,
    } else {
    }
    return
  }
  func.func @transform_0(%arg0: i32, %arg1: i32, %arg2: i32) -> (i32, i32) {
    %c0_i32 = arith.constant 0 : i32
    return %arg0, %arg2 : i32, i32
  }
  func.func @transform_1(%arg0: i32, %arg1: i32, %arg2: i32) -> (i32, i32) {
    %c0_i32 = arith.constant 0 : i32
    return %arg2, %arg1 : i32, i32
  }
  func.func @transform_2(%arg0: i32, %arg1: i32, %arg2: i32) -> (i32, i32) {
    %c0_i32 = arith.constant 0 : i32
    %c0_i32_0 = arith.constant 0 : i32
    return %c0_i32, %arg1 : i32, i32
  }
  func.func @transform_3(%arg0: i32, %arg1: i32, %arg2: i32) -> (i32, i32) {
    %c0_i32 = arith.constant 0 : i32
    return %arg0, %arg1 : i32, i32
  }
}

module attributes {stable_mosaic.version = 11 : i64} {
  func.func @_linear_kernel(%arg0: i32, %arg1: i32, %arg2: i32, %arg3: memref<32x32xf32, #tpu.memory_space<vmem>>, %arg4: memref<32x32xf32, #tpu.memory_space<vmem>>, %arg5: memref<1x32xf32, #tpu.memory_space<vmem>>, %arg6: memref<32x32xf32, #tpu.memory_space<vmem>>, %arg7: memref<32x32xf32, #tpu.memory_space<vmem>>) attributes {dimension_semantics = [#tpu.dimension_semantics<parallel>, #tpu.dimension_semantics<parallel>, #tpu.dimension_semantics<arbitrary>], iteration_bounds = array<i64: 1, 1, 1>, scalar_prefetch = 0 : i64, scratch_operands = 1 : i64, tpu.core_type = #tpu.core_type<tc>, window_params = [{transform_indices = @transform_0, window_bounds = array<i64: 32, 32>}, {transform_indices = @transform_1, window_bounds = array<i64: 32, 32>}, {transform_indices = @transform_2, window_bounds = array<i64: 1, 32>}, {transform_indices = @transform_3, window_bounds = array<i64: 32, 32>}]} {
    %c0_i32 = arith.constant 0 : i32
    %0 = arith.cmpi eq, %arg2, %c0_i32 : i32
    %1 = arith.extui %0 : i1 to i32
    %c0_i32_0 = arith.constant 0 : i32
    %2 = arith.cmpi ne, %1, %c0_i32_0 : i32
    scf.if %2 {
      %cst_10 = arith.constant 0.000000e+00 : f32
      %12 = vector.broadcast %cst_10 : f32 to vector<32x32xf32>
      %c0_11 = arith.constant 0 : index
      %c0_12 = arith.constant 0 : index
      %13 = vector.load %arg7[%c0_11, %c0_12] : memref<32x32xf32, #tpu.memory_space<vmem>>, vector<32x32xf32>
      tpu.vector_store %arg7[%c0_11, %c0_12], %12 {strides = array<i32>} : memref<32x32xf32, #tpu.memory_space<vmem>>, vector<32x32xf32>,
    } else {
    }
    %c0 = arith.constant 0 : index
    %c0_1 = arith.constant 0 : index
    %3 = vector.load %arg7[%c0, %c0_1] : memref<32x32xf32, #tpu.memory_space<vmem>>, vector<32x32xf32>
    %c0_2 = arith.constant 0 : index
    %c0_3 = arith.constant 0 : index
    %4 = vector.load %arg3[%c0_2, %c0_3] : memref<32x32xf32, #tpu.memory_space<vmem>>, vector<32x32xf32>
    %c0_4 = arith.constant 0 : index
    %c0_5 = arith.constant 0 : index
    %5 = vector.load %arg4[%c0_4, %c0_5] : memref<32x32xf32, #tpu.memory_space<vmem>>, vector<32x32xf32>
    %cst = arith.constant dense<0.000000e+00> : vector<32x32xf32>
    %6 = tpu.matmul %4, %5, %cst {dimension_numbers = #tpu.dot_dimension_numbers<[1], [0], [0], [1], [0, 0, 1, 1], [], []>} : vector<32x32xf32>, vector<32x32xf32>, vector<32x32xf32> -> vector<32x32xf32>
    %7 = arith.addf %3, %6 : vector<32x32xf32>
    %c0_6 = arith.constant 0 : index
    %c0_7 = arith.constant 0 : index
    %8 = vector.load %arg7[%c0_6, %c0_7] : memref<32x32xf32, #tpu.memory_space<vmem>>, vector<32x32xf32>
    tpu.vector_store %arg7[%c0_6, %c0_7], %7 {strides = array<i32>} : memref<32x32xf32, #tpu.memory_space<vmem>>, vector<32x32xf32>,
    %c0_i32_8 = arith.constant 0 : i32
    %9 = arith.cmpi eq, %arg2, %c0_i32_8 : i32
    %10 = arith.extui %9 : i1 to i32
    %c0_i32_9 = arith.constant 0 : i32
    %11 = arith.cmpi ne, %10, %c0_i32_9 : i32
    scf.if %11 {
      %c0_10 = arith.constant 0 : index
      %c0_11 = arith.constant 0 : index
      %12 = vector.load %arg7[%c0_10, %c0_11] : memref<32x32xf32, #tpu.memory_space<vmem>>, vector<32x32xf32>
      %c0_12 = arith.constant 0 : index
      %c0_13 = arith.constant 0 : index
      %13 = vector.load %arg5[%c0_12, %c0_13] : memref<1x32xf32, #tpu.memory_space<vmem>>, vector<1x32xf32>
      %14 = vector.broadcast %13 : vector<1x32xf32> to vector<32x32xf32>
      %15 = arith.addf %12, %14 : vector<32x32xf32>
      %c0_14 = arith.constant 0 : index
      %c0_15 = arith.constant 0 : index
      %16 = vector.load %arg6[%c0_14, %c0_15] : memref<32x32xf32, #tpu.memory_space<vmem>>, vector<32x32xf32>
      tpu.vector_store %arg6[%c0_14, %c0_15], %15 {strides = array<i32>} : memref<32x32xf32, #tpu.memory_space<vmem>>, vector<32x32xf32>,
    } else {
    }
    return
  }
  func.func @transform_0(%arg0: i32, %arg1: i32, %arg2: i32) -> (i32, i32) {
    %c0_i32 = arith.constant 0 : i32
    return %arg0, %arg2 : i32, i32
  }
  func.func @transform_1(%arg0: i32, %arg1: i32, %arg2: i32) -> (i32, i32) {
    %c0_i32 = arith.constant 0 : i32
    return %arg2, %arg1 : i32, i32
  }
  func.func @transform_2(%arg0: i32, %arg1: i32, %arg2: i32) -> (i32, i32) {
    %c0_i32 = arith.constant 0 : i32
    %c0_i32_0 = arith.constant 0 : i32
    return %c0_i32, %arg1 : i32, i32
  }
  func.func @transform_3(%arg0: i32, %arg1: i32, %arg2: i32) -> (i32, i32) {
    %c0_i32 = arith.constant 0 : i32
    return %arg0, %arg1 : i32, i32
  }
}

module attributes {stable_mosaic.version = 11 : i64} {
  func.func @_linear_kernel(%arg0: i32, %arg1: i32, %arg2: i32, %arg3: memref<16x32xf32, #tpu.memory_space<vmem>>, %arg4: memref<32x32xf32, #tpu.memory_space<vmem>>, %arg5: memref<1x32xf32, #tpu.memory_space<vmem>>, %arg6: memref<16x32xf32, #tpu.memory_space<vmem>>, %arg7: memref<16x32xf32, #tpu.memory_space<vmem>>) attributes {dimension_semantics = [#tpu.dimension_semantics<parallel>, #tpu.dimension_semantics<parallel>, #tpu.dimension_semantics<arbitrary>], iteration_bounds = array<i64: 1, 1, 1>, scalar_prefetch = 0 : i64, scratch_operands = 1 : i64, tpu.core_type = #tpu.core_type<tc>, window_params = [{transform_indices = @transform_0, window_bounds = array<i64: 16, 32>}, {transform_indices = @transform_1, window_bounds = array<i64: 32, 32>}, {transform_indices = @transform_2, window_bounds = array<i64: 1, 32>}, {transform_indices = @transform_3, window_bounds = array<i64: 16, 32>}]} {
    %c0_i32 = arith.constant 0 : i32
    %0 = arith.cmpi eq, %arg2, %c0_i32 : i32
    %1 = arith.extui %0 : i1 to i32
    %c0_i32_0 = arith.constant 0 : i32
    %2 = arith.cmpi ne, %1, %c0_i32_0 : i32
    scf.if %2 {
      %cst_10 = arith.constant 0.000000e+00 : f32
      %12 = vector.broadcast %cst_10 : f32 to vector<16x32xf32>
      %c0_11 = arith.constant 0 : index
      %c0_12 = arith.constant 0 : index
      %13 = vector.load %arg7[%c0_11, %c0_12] : memref<16x32xf32, #tpu.memory_space<vmem>>, vector<16x32xf32>
      tpu.vector_store %arg7[%c0_11, %c0_12], %12 {strides = array<i32>} : memref<16x32xf32, #tpu.memory_space<vmem>>, vector<16x32xf32>,
    } else {
    }
    %c0 = arith.constant 0 : index
    %c0_1 = arith.constant 0 : index
    %3 = vector.load %arg7[%c0, %c0_1] : memref<16x32xf32, #tpu.memory_space<vmem>>, vector<16x32xf32>
    %c0_2 = arith.constant 0 : index
    %c0_3 = arith.constant 0 : index
    %4 = vector.load %arg3[%c0_2, %c0_3] : memref<16x32xf32, #tpu.memory_space<vmem>>, vector<16x32xf32>
    %c0_4 = arith.constant 0 : index
    %c0_5 = arith.constant 0 : index
    %5 = vector.load %arg4[%c0_4, %c0_5] : memref<32x32xf32, #tpu.memory_space<vmem>>, vector<32x32xf32>
    %cst = arith.constant dense<0.000000e+00> : vector<16x32xf32>
    %6 = tpu.matmul %4, %5, %cst {dimension_numbers = #tpu.dot_dimension_numbers<[1], [0], [0], [1], [0, 0, 1, 1], [], []>} : vector<16x32xf32>, vector<32x32xf32>, vector<16x32xf32> -> vector<16x32xf32>
    %7 = arith.addf %3, %6 : vector<16x32xf32>
    %c0_6 = arith.constant 0 : index
    %c0_7 = arith.constant 0 : index
    %8 = vector.load %arg7[%c0_6, %c0_7] : memref<16x32xf32, #tpu.memory_space<vmem>>, vector<16x32xf32>
    tpu.vector_store %arg7[%c0_6, %c0_7], %7 {strides = array<i32>} : memref<16x32xf32, #tpu.memory_space<vmem>>, vector<16x32xf32>,
    %c0_i32_8 = arith.constant 0 : i32
    %9 = arith.cmpi eq, %arg2, %c0_i32_8 : i32
    %10 = arith.extui %9 : i1 to i32
    %c0_i32_9 = arith.constant 0 : i32
    %11 = arith.cmpi ne, %10, %c0_i32_9 : i32
    scf.if %11 {
      %c0_10 = arith.constant 0 : index
      %c0_11 = arith.constant 0 : index
      %12 = vector.load %arg7[%c0_10, %c0_11] : memref<16x32xf32, #tpu.memory_space<vmem>>, vector<16x32xf32>
      %c0_12 = arith.constant 0 : index
      %c0_13 = arith.constant 0 : index
      %13 = vector.load %arg5[%c0_12, %c0_13] : memref<1x32xf32, #tpu.memory_space<vmem>>, vector<1x32xf32>
      %14 = vector.broadcast %13 : vector<1x32xf32> to vector<16x32xf32>
      %15 = arith.addf %12, %14 : vector<16x32xf32>
      %c0_14 = arith.constant 0 : index
      %c0_15 = arith.constant 0 : index
      %16 = vector.load %arg6[%c0_14, %c0_15] : memref<16x32xf32, #tpu.memory_space<vmem>>, vector<16x32xf32>
      tpu.vector_store %arg6[%c0_14, %c0_15], %15 {strides = array<i32>} : memref<16x32xf32, #tpu.memory_space<vmem>>, vector<16x32xf32>,
    } else {
    }
    return
  }
  func.func @transform_0(%arg0: i32, %arg1: i32, %arg2: i32) -> (i32, i32) {
    %c0_i32 = arith.constant 0 : i32
    return %arg0, %arg2 : i32, i32
  }
  func.func @transform_1(%arg0: i32, %arg1: i32, %arg2: i32) -> (i32, i32) {
    %c0_i32 = arith.constant 0 : i32
    return %arg2, %arg1 : i32, i32
  }
  func.func @transform_2(%arg0: i32, %arg1: i32, %arg2: i32) -> (i32, i32) {
    %c0_i32 = arith.constant 0 : i32
    %c0_i32_0 = arith.constant 0 : i32
    return %c0_i32, %arg1 : i32, i32
  }
  func.func @transform_3(%arg0: i32, %arg1: i32, %arg2: i32) -> (i32, i32) {
    %c0_i32 = arith.constant 0 : i32
    return %arg0, %arg1 : i32, i32
  }
}

</mosaic_0001>

<bundles_post_ra>
// kernel: co_attentional_forward.6
= control target key start
LH: loop header
LB: loop body
LE: loop exit
PB: predicated region body
PF: predicated region fallthrough
CT: control target
= control target key end

     0   :  { %vm29_vm0 = vcmask 261120   ;;  %vm18_vm1 = vcmask 785408   ;;  %v165_v3 = vmov 0.0   ;;  %s221_s1 = inlined_call_operand.vmem [shape: f32[32,96], index: 1, kind: input, shape index: {}]   ;;  %s222_s0 = inlined_call_operand.vmem [shape: f32[16,32], index: 0, kind: input, shape index: {}]   ;;  %s223_s2 = inlined_call_operand.vmem [shape: f32[1,96], index: 2, kind: input, shape index: {}]   ;;  %s224_s3 = inlined_call_operand.vmem [shape: f32[16,96], index: 3, kind: output, shape index: {}]  }
   0x1   :  { %v25_v0 = vld [vmem:[%s221_s1] sm:$0xff]  ;;  %v26_v1 = vld [vmem:[%s221_s1 + $0x8] sm:$0xff]  ;;  %v27_v2 = vld [vmem:[%s221_s1 + $0x10] sm:$0xff]  ;;  %20 = vst.msk [vmem:[#allocation2 + $0x8] sm:$0xff] %vm18_vm1, %v165_v3 }
   0x2   :  { %19 = vst.msk [vmem:[#allocation2] sm:$0xff] %vm18_vm1, %v165_v3  ;;  %v156_v4 = vpack.c.bf16 %v26_v1, %v25_v0  ;;  %v28_v5 = vld [vmem:[%s221_s1 + $0x18] sm:$0xff]  ;;  %v23_v6 = vld [vmem:[%s222_s0] sm:$0xff]  ;;  %v24_v8 = vld [vmem:[%s222_s0 + $0x8] sm:$0xff] }
   0x3   :  { %v160_v7 = vpack.c.bf16 %v28_v5, %v27_v2  ;;  %153 = vmatprep.mubr.msk.f32.mxu0 %vm29_vm0, %v23_v6  ;;  %v138_v15 = vld [vmem:[%s223_s2] ss:$0 sm:$0xff] }
   0x4   :  { %157 = vmatprep.subr.bf16.mxu0 %v156_v4 }
   0x5   :  { %159 = vmatpush3.bf16.msra.mxu0 %v156_v4 }
   0x6   :  { %161 = vmatprep.subr.bf16.mxu0 %v160_v7 }
   0x8   :  { %v22_v9 = vld [vmem:[#allocation2 + $0x8] sm:$0xff] }
   0x9   :  { %163 = vmatpush3.bf16.msra.mxu0 %v160_v7  ;;  %v21_v10 = vld [vmem:[#allocation2] sm:$0xff] }
   0xc   :  { %154 = vmatmul.mubr.msk.f32.vlgmr.msra.gmra.mrb[0].mxu0 %vm29_vm0, %v24_v8 }
  0xdf   :  { %v155_v11 = vpop.f32.mrb[0].mxu0 }
  0xe0   :  { %v112_v12 = vadd.f32 %v155_v11, %v22_v9  ;;  %v102_v13 = vpop.f32.mrb[1].mxu0 }
  0xe1   :  { %v111_v14 = vadd.f32 %v102_v13, %v21_v10 }
  0xe2   :  { %115 = vst.msk [vmem:[#allocation2 + $0x8] sm:$0xff] %vm18_vm1, %v112_v12 }
  0xe3   :  { %114 = vst.msk [vmem:[#allocation2] sm:$0xff] %vm18_vm1, %v111_v14 }
  0xe9   :  { %v120_v16 = vld [vmem:[#allocation2 + $0x8] sm:$0xff] }
  0xea   :  { %v129_v17 = vadd.f32 %v138_v15, %v120_v16  ;;  %v119_v18 = vld [vmem:[#allocation2] sm:$0xff] }
  0xeb   :  { %v128_v19 = vadd.f32 %v138_v15, %v119_v18 }
  0xec   :  { %131 = vst.msk [vmem:[%s224_s3 + $0x8] sm:$0xff] %vm18_vm1, %v129_v17 }
  0xed   :  { %130 = vst.msk [vmem:[%s224_s3] sm:$0xff] %vm18_vm1, %v128_v19 }

// kernel: co_attentional_forward.5
= control target key start
LH: loop header
LB: loop body
LE: loop exit
PB: predicated region body
PF: predicated region fallthrough
CT: control target
= control target key end

     0   :  { %vm35_vm0 = vcmask 261120   ;;  %vm18_vm1 = vcmask 785408   ;;  %v208_v3 = vmov 0.0   ;;  %s284_s1 = inlined_call_operand.vmem [shape: f32[32,96], index: 1, kind: input, shape index: {}]   ;;  %s285_s0 = inlined_call_operand.vmem [shape: f32[32,32], index: 0, kind: input, shape index: {}]   ;;  %s286_s2 = inlined_call_operand.vmem [shape: f32[1,96], index: 2, kind: input, shape index: {}]   ;;  %s287_s3 = inlined_call_operand.vmem [shape: f32[32,96], index: 3, kind: output, shape index: {}]  }
   0x1   :  { %v31_v0 = vld [vmem:[%s284_s1] sm:$0xff]  ;;  %v32_v1 = vld [vmem:[%s284_s1 + $0x8] sm:$0xff]  ;;  %v33_v2 = vld [vmem:[%s284_s1 + $0x10] sm:$0xff]  ;;  %20 = vst.msk [vmem:[#allocation2 + $0x8] sm:$0xff] %vm18_vm1, %v208_v3 }
   0x2   :  { %19 = vst.msk [vmem:[#allocation2] sm:$0xff] %vm18_vm1, %v208_v3  ;;  %21 = vst.msk [vmem:[#allocation2 + $0x10] sm:$0xff] %vm18_vm1, %v208_v3  ;;  %v195_v4 = vpack.c.bf16 %v32_v1, %v31_v0  ;;  %v34_v5 = vld [vmem:[%s284_s1 + $0x18] sm:$0xff]  ;;  %v27_v6 = vld [vmem:[%s285_s0] sm:$0xff] }
   0x3   :  { %22 = vst.msk [vmem:[#allocation2 + $0x18] sm:$0xff] %vm18_vm1, %v208_v3  ;;  %v29_v7 = vld [vmem:[%s285_s0 + $0x10] sm:$0xff]  ;;  %v199_v8 = vpack.c.bf16 %v34_v5, %v33_v2  ;;  %189 = vmatprep.mubr.msk.f32.mxu0 %vm35_vm0, %v27_v6  ;;  %v28_v9 = vld [vmem:[%s285_s0 + $0x8] sm:$0xff]  ;;  %v30_v10 = vld [vmem:[%s285_s0 + $0x18] sm:$0xff] }
   0x4   :  { %192 = vmatprep.mubr.msk.f32.mxu1 %vm35_vm0, %v29_v7  ;;  %196 = vmatprep.subr.bf16.mxu0 %v195_v4  ;;  %v172_v23 = vld [vmem:[%s286_s2] ss:$0 sm:$0xff] }
   0x5   :  { %203 = vmatprep.subr.bf16.mxu1 %v195_v4  ;;  %198 = vmatpush3.bf16.msra.mxu0 %v195_v4 }
   0x6   :  { %205 = vmatpush3.bf16.msra.mxu1 %v195_v4  ;;  %200 = vmatprep.subr.bf16.mxu0 %v199_v8 }
   0x7   :  { %204 = vmatprep.subr.bf16.mxu1 %v199_v8 }
   0x8   :  { %v24_v11 = vld [vmem:[#allocation2 + $0x8] sm:$0xff] }
   0x9   :  { %202 = vmatpush3.bf16.msra.mxu0 %v199_v8  ;;  %v23_v13 = vld [vmem:[#allocation2] sm:$0xff]  ;;  %v25_v14 = vld [vmem:[#allocation2 + $0x10] sm:$0xff] }
   0xa   :  { %206 = vmatpush3.bf16.msra.mxu1 %v199_v8  ;;  %v26_v12 = vld [vmem:[#allocation2 + $0x18] sm:$0xff] }
   0xc   :  { %190 = vmatmul.mubr.msk.f32.vlgmr.msra.gmra.mrb[0].mxu0 %vm35_vm0, %v28_v9 }
   0xd   :  { %193 = vmatmul.mubr.msk.f32.vlgmr.msra.gmra.mrb[0].mxu1 %vm35_vm0, %v30_v10 }
  0xdf   :  { %v191_v15 = vpop.f32.mrb[0].mxu0 }
  0xe0   :  { %v194_v16 = vpop.f32.mrb[0].mxu1  ;;  %v134_v17 = vadd.f32 %v191_v15, %v24_v11  ;;  %v114_v19 = vpop.f32.mrb[1].mxu0 }
  0xe1   :  { %v136_v18 = vadd.f32 %v194_v16, %v26_v12  ;;  %v124_v20 = vpop.f32.mrb[1].mxu1  ;;  %v133_v21 = vadd.f32 %v114_v19, %v23_v13 }
  0xe2   :  { %v135_v22 = vadd.f32 %v124_v20, %v25_v14  ;;  %139 = vst.msk [vmem:[#allocation2 + $0x8] sm:$0xff] %vm18_vm1, %v134_v17 }
  0xe3   :  { %141 = vst.msk [vmem:[#allocation2 + $0x18] sm:$0xff] %vm18_vm1, %v136_v18  ;;  %138 = vst.msk [vmem:[#allocation2] sm:$0xff] %vm18_vm1, %v133_v21 }
  0xe4   :  { %140 = vst.msk [vmem:[#allocation2 + $0x10] sm:$0xff] %vm18_vm1, %v135_v22 }
  0xe9   :  { %v146_v24 = vld [vmem:[#allocation2 + $0x8] sm:$0xff] }
  0xea   :  { %v148_v25 = vld [vmem:[#allocation2 + $0x18] sm:$0xff]  ;;  %v157_v26 = vadd.f32 %v172_v23, %v146_v24  ;;  %v145_v28 = vld [vmem:[#allocation2] sm:$0xff] }
  0xeb   :  { %v159_v27 = vadd.f32 %v172_v23, %v148_v25  ;;  %v147_v29 = vld [vmem:[#allocation2 + $0x10] sm:$0xff]  ;;  %v156_v30 = vadd.f32 %v172_v23, %v145_v28 }
  0xec   :  { %v158_v31 = vadd.f32 %v172_v23, %v147_v29  ;;  %161 = vst.msk [vmem:[%s287_s3 + $0x8] sm:$0xff] %vm18_vm1, %v157_v26 }
  0xed   :  { %163 = vst.msk [vmem:[%s287_s3 + $0x18] sm:$0xff] %vm18_vm1, %v159_v27  ;;  %160 = vst.msk [vmem:[%s287_s3] sm:$0xff] %vm18_vm1, %v156_v30 }
  0xee   :  { %162 = vst.msk [vmem:[%s287_s3 + $0x10] sm:$0xff] %vm18_vm1, %v158_v31 }

// kernel: co_attentional_forward.8
= control target key start
LH: loop header
LB: loop body
LE: loop exit
PB: predicated region body
PF: predicated region fallthrough
CT: control target
= control target key end

     0   :  { %vm19_vm0 = vcmask 261120   ;;  %v247_v7 = vmov 0.0   ;;  %s326_s0 = inlined_call_operand.vmem [shape: f32[32,32], index: 0, kind: input, shape index: {}]   ;;  %s327_s1 = inlined_call_operand.vmem [shape: f32[32,32], index: 1, kind: input, shape index: {}]   ;;  %s328_s2 = inlined_call_operand.vmem [shape: f32[1,32], index: 2, kind: input, shape index: {}]   ;;  %s329_s3 = inlined_call_operand.hbm [shape: f32[32,32], index: 3, kind: output, shape index: {}]  }
   0x1   :  { %v32_v0 = vld [vmem:[%s327_s1] sm:$0xff]  ;;  %v33_v1 = vld [vmem:[%s327_s1 + $0x8] sm:$0xff]  ;;  %v34_v2 = vld [vmem:[%s327_s1 + $0x10] sm:$0xff]  ;;  %21 = vst.msk [vmem:[#allocation2 + $0x8] sm:$0xff] %vm19_vm0, %v247_v7 }
   0x2   :  { %v207_v3 = vpack.c.bf16 %v33_v1, %v32_v0  ;;  %v35_v4 = vld [vmem:[%s327_s1 + $0x18] sm:$0xff]  ;;  %v28_v5 = vld [vmem:[%s326_s0] sm:$0xff]  ;;  %v30_v6 = vld [vmem:[%s326_s0 + $0x10] sm:$0xff]  ;;  %20 = vst.msk [vmem:[#allocation2] sm:$0xff] %vm19_vm0, %v247_v7 }
   0x3   :  { %22 = vst.msk [vmem:[#allocation2 + $0x10] sm:$0xff] %vm19_vm0, %v247_v7  ;;  %23 = vst.msk [vmem:[#allocation2 + $0x18] sm:$0xff] %vm19_vm0, %v247_v7  ;;  %v211_v8 = vpack.c.bf16 %v35_v4, %v34_v2  ;;  %201 = vmatprep.mubr.msk.f32.mxu0 %vm19_vm0, %v28_v5  ;;  %204 = vmatprep.mubr.msk.f32.mxu1 %vm19_vm0, %v30_v6 }
   0x4   :  { %8 = vsyncpa [#allocation4], 0  ;;  %208 = vmatprep.subr.bf16.mxu0 %v207_v3  ;;  %215 = vmatprep.subr.bf16.mxu1 %v207_v3  ;;  %v29_v9 = vld [vmem:[%s326_s0 + $0x8] sm:$0xff]  ;;  %v31_v10 = vld [vmem:[%s326_s0 + $0x18] sm:$0xff]  ;;  %s248_s28 = smov [#allocation3]  }
   0x5   :  { %210 = vmatpush3.bf16.msra.mxu0 %v207_v3  ;;  %217 = vmatpush3.bf16.msra.mxu1 %v207_v3  ;;  %v184_v23 = vld [vmem:[%s328_s2] ss:$0 sm:$0xff]  ;;  %s169_s29 = sshll.u32 %s248_s28, 4  ;;  %s170_s29 = int_to_ptr.vmem [resolvable:$true] %s169_s29 }
   0x6   :  { %212 = vmatprep.subr.bf16.mxu0 %v211_v8  ;;  %216 = vmatprep.subr.bf16.mxu1 %v211_v8  ;;  %s223_s2 = scalar_lea.vmem %s170_s29, 512  ;;  %p228_p1 = scmp.lt.s32.totalorder %s170_s29, %s170_s29 }
   0x7   :  { %p224_p0 = scmp.ne.s32.totalorder %s170_s29, %s223_s2  ;;  %p229_p2 = scmp.lt.s32.totalorder %s223_s2, %s223_s2 }
   0x8   :  { %v25_v11 = vld [vmem:[#allocation2 + $0x8] sm:$0xff] }
   0x9   :  { %214 = vmatpush3.bf16.msra.mxu0 %v211_v8  ;;  %218 = vmatpush3.bf16.msra.mxu1 %v211_v8  ;;  %v24_v13 = vld [vmem:[#allocation2] sm:$0xff]  ;;  %p230_p3 = por %p229_p2, %p228_p1 }
   0xa   :  { %v27_v12 = vld [vmem:[#allocation2 + $0x18] sm:$0xff]  ;;  %v26_v14 = vld [vmem:[#allocation2 + $0x10] sm:$0xff] }
   0xb   :  { %p231_p4 = pnand %p230_p3, %p224_p0 }
   0xc   :  { %202 = vmatmul.mubr.msk.f32.vlgmr.msra.gmra.mrb[0].mxu0 %vm19_vm0, %v29_v9  ;;  %205 = vmatmul.mubr.msk.f32.vlgmr.msra.gmra.mrb[0].mxu1 %vm19_vm0, %v31_v10 }
  0xdf   :  { %v203_v15 = vpop.f32.mrb[0].mxu0  ;;  %v206_v16 = vpop.f32.mrb[0].mxu1 }
  0xe0   :  { %v135_v17 = vadd.f32 %v203_v15, %v25_v11  ;;  %v137_v18 = vadd.f32 %v206_v16, %v27_v12  ;;  %v115_v19 = vpop.f32.mrb[1].mxu0  ;;  %v125_v20 = vpop.f32.mrb[1].mxu1 }
  0xe1   :  { %v134_v21 = vadd.f32 %v115_v19, %v24_v13  ;;  %v136_v22 = vadd.f32 %v125_v20, %v26_v14 }
  0xe2   :  { %139 = vst.msk [vmem:[#allocation2 + $0x8] sm:$0xff] %vm19_vm0, %v135_v17  ;;  %141 = vst.msk [vmem:[#allocation2 + $0x18] sm:$0xff] %vm19_vm0, %v137_v18 }
  0xe3   :  { %138 = vst.msk [vmem:[#allocation2] sm:$0xff] %vm19_vm0, %v134_v21  ;;  %140 = vst.msk [vmem:[#allocation2 + $0x10] sm:$0xff] %vm19_vm0, %v136_v22 }
  0xe9   :  { %v146_v24 = vld [vmem:[#allocation2 + $0x8] sm:$0xff]  ;;  %v148_v25 = vld [vmem:[#allocation2 + $0x18] sm:$0xff] }
  0xea   :  { %v145_v26 = vld [vmem:[#allocation2] sm:$0xff]  ;;  %v147_v27 = vld [vmem:[#allocation2 + $0x10] sm:$0xff]  ;;  %v157_v28 = vadd.f32 %v184_v23, %v146_v24  ;;  %v159_v29 = vadd.f32 %v184_v23, %v148_v25 }
  0xeb   :  { %v156_v30 = vadd.f32 %v184_v23, %v145_v26  ;;  %v158_v31 = vadd.f32 %v184_v23, %v147_v27 }
  0xec   :  { %161 = vst.msk [vmem:[#allocation3 + $0x8] sm:$0xff] %vm19_vm0, %v157_v28  ;;  %163 = vst.msk [vmem:[#allocation3 + $0x18] sm:$0xff] %vm19_vm0, %v159_v29 }
  0xed   :  { %160 = vst.msk [vmem:[#allocation3] sm:$0xff] %vm19_vm0, %v156_v30  ;;  %162 = vst.msk [vmem:[#allocation3 + $0x10] sm:$0xff] %vm19_vm0, %v158_v31 }
  0xee   :  { %234 = shalt.err (!%p231_p4)
}
  0xef   :  { %s235_s5 = scalar_lea.hbm %s329_s3, 512 }
  0xf0   :  { %p236_p5 = scmp.ne.s32.totalorder %s329_s3, %s235_s5  ;;  %p239_p6 = scmp.lt.u32.totalorder %s235_s5, %s329_s3 }
  0xf2   :  { %p241_p7 = pnand %p239_p6, %p236_p5 }
  0xf4   :  { %244 = shalt.err (!%p241_p7)
}
  0xf5   :  { %s249_s10 = smov 128   ;;  %s250_s11 = smov 8  }
  0xf6   :  { %175 = dma.vmem_to_hbm [thread:$0]  %s170_s29, 512, %s329_s3, [#allocation4], %s249_s10, %s249_s10, %s250_s11  }
  0xf7   :  { %245 = dma.done.wait [#allocation4], 512  }
  0xf8   :  { %246 = vsyncadd [#allocation4], 4294966784 }
  0xf9   :  { %179 = vsyncpa [#allocation4], 1 }

// kernel: co_attentional_forward.7
= control target key start
LH: loop header
LB: loop body
LE: loop exit
PB: predicated region body
PF: predicated region fallthrough
CT: control target
= control target key end

     0   :  { %s2245_s12 = smov 0   ;;  %s2446_s0 = inlined_call_operand.vmem [shape: f32[2,16,96], index: 0, kind: input, shape index: {}]   ;;  %s2447_s1 = inlined_call_operand.vmem [shape: f32[2,8,96], index: 1, kind: input, shape index: {}]   ;;  %s2448_s2 = inlined_call_operand.vmem [shape: f32[2,16,32], index: 2, kind: output, shape index: {0}]   ;;  %s2449_s3 = inlined_call_operand.vmem [shape: f32[2,8,32], index: 3, kind: output, shape index: {1}]  }
   0x1 LB: > { %s1864_s13 = sadd.s32 4294967295, %s2206_s12   ;;  %p1868_p0 = scmp.ge.s32.totalorder %s2206_s12, 1  ;;  %s2206_s12 = sphi %s2245_s12, %s14_s12  }
   0x2   : > { %p149_p1 = scmp.lt.s32.totalorder %s2206_s12, 3 }
   0x4   : > { %p150_p2 = pnand %p1868_p0, %p149_p1 }
   0x5   : > { %p181_p3 = scmp.lt.s32.totalorder (!%p150_p2), %s1864_s13, 1  ;;  %s2208_s22 = smov (!%p150_p2), 96   ;;  %vm207_vm0 = vcmask (!%p150_p2), 64512   ;;  %v2210_v22 = vmov (!%p150_p2), 0.0|0.0   ;;  %vm2211_vm1 = vmmov (!%p150_p2), 0   ;;  %v2212_v23 = vmov (!%p150_p2), 0.0  }
   0x6   : > { %153 = sbr.rel (%p150_p2) target bundleno = 3195 (0xc7b), region = 28  ;;  %s2209_s23 = smov (!%p150_p2), 64   ;;  %vm2297_vm2 = vmpackc.low (!%p150_p2), %vm207_vm0, %vm207_vm0  ;;  %vm486_vm3 = vcmask (!%p150_p2), 130048   ;;  %vm787_vm4 = vcmask (!%p150_p2), 130112   ;;  %vm1183_vm5 = vcmask (!%p150_p2), 195712   ;;  %vm1579_vm6 = vcmask (!%p150_p2), 261312  }
   0x7   : > { %s2213_s24 = smov (!%p150_p2), 88   ;;  %s2214_s25 = smov (!%p150_p2), 120  }
   0x8   : > { %s2215_s5 = smov (!%p150_p2), 56   ;;  %s2216_s6 = smov (!%p150_p2), 80  }
   0x9   : > { %s2217_s7 = smov (!%p150_p2), 112   ;;  %s2218_s8 = smov (!%p150_p2), 48  }
   0xa   : > { %s2219_s9 = smov (!%p150_p2), 72   ;;  %s2220_s10 = smov (!%p150_p2), 104  }
   0xb   : > { %s2221_s11 = smov (!%p150_p2), 40  }
   0xd   : > { %s2453_s13 = smov (!%p181_p3, %s1864_s13), 1 }
   0xe   : > { %s1871_s14 = sshll.u32 %s2453_s13, 3  ;;  %s1913_s15 = sshll.u32 %s2453_s13, 4 }
   0xf   : > { %s189_s18 = scalar_lea.vmem %s2447_s1, %s1871_s14  ;;  %s185_s21 = scalar_lea.vmem %s2446_s0, %s1913_s15 }
  0x10   : > { %v2267_v0 = vld [vmem:[%s189_s18] sm:$0xff]  ;;  %v200_v3 = vld [vmem:[%s185_s21 + $0x8] sm:$0xff]  ;;  %s2319_s28 = scalar_lea.vmem %s2448_s2, %s1913_s15  ;;  %s2346_s4 = scalar_lea.vmem %s2449_s3, %s1871_s14 }
  0x11   : > { %v199_v1 = vld [vmem:[%s185_s21] sm:$0xff]  ;;  %205 = vrot.lane.b32.xlu0 %v2267_v0, %s2208_s22  ;;  %v2276_v5 = vmul.f32 0.35355338, %v200_v3  ;;  %v2308_v35 = vmul.f32 0.35355338, %v2267_v0  ;;  %s2222_s13 = smov 8  }
  0x12   : > { %v2271_v2 = vmul.f32 0.35355338, %v199_v1  ;;  %v2284_v10 = vpack.i.bf16 %v200_v3, %v199_v1  ;;  %s2223_s14 = smov 16   ;;  %s2224_s15 = smov 24  }
  0x14   : > { %1965 = vmatprep.mubr.msk.f32.mxu0 %vm207_vm0, %v2271_v2 }
  0x83   : > { %v206_v4 = vpop.permute.xlu0 %205 }
  0x84   : > { %1963 = vmatprep.subr.msk.mxu0 %vm207_vm0, %v206_v4 }
  0x85   : > { %1964 = vmatpush3.xpose.msk.msra.mxu0 %vm207_vm0, %v206_v4 }
  0x86   : > { %2063 = vmatprep.subr.bf16.mxu0 %v2210_v22 }
  0x88   : > { %1966 = vmatmul.mubr.msk.f32.vlgmr.msra.gmra.mrb[0].mxu0 %vm207_vm0, %v2276_v5 }
  0x89   : > { %1984 = vmatprep.mubr.msk.f32.mxu0 %vm2211_vm1, %v2212_v23 }
 0x15b   : > { %v1967_v6 = vpop.f32.mrb[0].mxu0 }
 0x15c   : > { %v282_v7 = vpop.f32.mrb[1].mxu0  ;;  %v294_v8 = vsel %vm207_vm0, %v1967_v6, -inf }
 0x15d   : > { %295 = vmax.xlane.f32.xlu1 %v294_v8  ;;  %v291_v9 = vsel %vm207_vm0, %v282_v7, -inf }
 0x15e   : > { %292 = vmax.xlane.f32.xlu0 %v291_v9 }
 0x16e   : > { %313 = vrot.lane.b32.xlu1 %v2267_v0, %s2209_s23 }
 0x174   : > { %2118 = vrot.lane.b32.xlu0 %v2284_v10, %s2209_s23 }
 0x178   : > { %590 = vrot.lane.b32.xlu0 %v2267_v0, %s2213_s24 }
 0x17c   : > { %585 = vrot.lane.b32.xlu0 %v2271_v2, %s2214_s25 }
 0x1ea   : > { %v296_v11 = vpop.xlane.xlu1 %295 }
 0x1eb   : > { %v298_v12 = vsub.f32 %v1967_v6, %v296_v11  ;;  %v293_v13 = vpop.xlane.xlu0 %292 }
 0x1ec   : > { %v297_v14 = vsub.f32 %v282_v7, %v293_v13 }
 0x1ed   : > { %v301_v15 = vmul.f32 1.442695, %v298_v12 }
 0x1ee   : > { %v299_v16 = vmul.f32 1.442695, %v297_v14  ;;  %v314_v17 = vpop.permute.xlu1 %313 }
 0x1ef   : > { %2152 = vpow2.f32 %v301_v15  ;;  %1968 = vmatprep.subr.mxu1 %v314_v17  ;;  %v2119_v41 = vpop.permute.xlu0 %2118 }
 0x1f0   : > { %1969 = vmatpush3.msra.mxu1 %v314_v17  ;;  %2154 = vpow2.f32 %v299_v16  ;;  %v2121_v42 = vunpack.i.h.bf16 %v2119_v41  ;;  %v2120_v43 = vunpack.i.l.bf16 %v2119_v41 }
 0x1f1   : > { %2059 = vmatprep.subr.bf16.mxu1 %v2210_v22 }
 0x1f2   : > { %v2064_v44 = vpack.c.bf16 %v2121_v42, %v2120_v43 }
 0x1f3   : > { %v591_v45 = vpop.permute.xlu0 %590 }
 0x1f4   : > { %2065 = vmatpush3.bf16.msra.mxu0 %v2064_v44 }
 0x1f5   : > { %1987 = vmatprep.subr.msk.mxu0 %vm207_vm0, %v591_v45 }
 0x1f7   : > { %v586_v51 = vpop.permute.xlu0 %585 }
 0x1f9   : > { %v2153_v18 = vpop.eup %2152 }
 0x1fa   : > { %v306_v19 = vsel %vm207_vm0, %v2153_v18, 0.0  ;;  %v2155_v20 = vpop.eup %2154 }
 0x1fb   : > { %307 = vadd.xlane.f32.xlu1 %v306_v19  ;;  %v303_v21 = vsel %vm207_vm0, %v2155_v20, 0.0 }
 0x1ff   : > { %304 = vadd.xlane.f32.xlu1 %v303_v21 }
 0x210   : > { %2113 = vrot.lane.b32.xlu1 %v2284_v10, %s2208_s22 }
 0x288   : > { %v308_v24 = vpop.xlane.xlu1 %307 }
 0x289   : > { %2156 = vrcp.f32 %v308_v24 }
 0x28c   : > { %v305_v25 = vpop.xlane.xlu1 %304 }
 0x28d   : > { %2158 = vrcp.f32 %v305_v25 }
 0x290   : > { %v2114_v26 = vpop.permute.xlu1 %2113 }
 0x291   : > { %v2116_v27 = vunpack.i.h.bf16 %v2114_v26  ;;  %v2115_v28 = vunpack.i.l.bf16 %v2114_v26 }
 0x293   : > { %v2157_v29 = vpop.eup %2156  ;;  %v2060_v31 = vpack.c.bf16 %v2116_v27, %v2115_v28 }
 0x294   : > { %v312_v33 = vmul.f32 %v2157_v29, %v2153_v18 }
 0x297   : > { %v2159_v30 = vpop.eup %2158 }
 0x298   : > { %v311_v32 = vmul.f32 %v2159_v30, %v2155_v20 }
 0x29a   : > { %1970 = vmatprep.mubr.msk.f32.mxu1 %vm207_vm0, %v311_v32 }
 0x29b   : > { %1971 = vmatmul.mubr.msk.f32.vlgmr.msra.gmra.mrb[0].mxu1 %vm207_vm0, %v312_v33 }
 0x29c   : > { %2062 = vmatpush3.bf16.xpose.msk.msra.mxu1 %vm2297_vm2, %v2060_v31  ;;  %1977 = vmatprep.mubr.msk.f32.mxu1 %vm2211_vm1, %v2212_v23 }
 0x2a3   : > { %1978 = vmatmul.mubr.msk.f32.vlgmr.msra.gmra.mrb[2].mxu1 %vm207_vm0, %v2308_v35 }
 0x36e   : > { %v1972_v36 = vpop.f32.mrb[0].mxu1 }
 0x36f   : > { %398 = vst.msk [vmem:[%s2319_s28 + $0x8] sm:$0xff] %vm207_vm0, %v1972_v36  ;;  %v388_v37 = vpop.f32.mrb[1].mxu1 }
 0x370   : > { %397 = vst.msk [vmem:[%s2319_s28] sm:$0xff] %vm207_vm0, %v388_v37 }
 0x376   : > { %v482_v38 = vpop.f32.mrb[2].mxu1 }
 0x377   : > { %v1979_v39 = vpop.f32.mrb[3].mxu1  ;;  %v487_v40 = vsel %vm486_vm3, %v482_v38, -inf }
 0x378   : > { %488 = vmax.xlane.f32.xlu1 %v487_v40 }
 0x389   : > { %2123 = vrot.lane.b32.xlu1 %v2284_v10, %s2213_s24 }
 0x405   : > { %v489_v46 = vpop.xlane.xlu1 %488 }
 0x406   : > { %v490_v47 = vsub.f32 %v482_v38, %v489_v46 }
 0x408   : > { %v491_v48 = vmul.f32 1.442695, %v490_v47 }
 0x409   : > { %v2124_v53 = vpop.permute.xlu1 %2123 }
 0x40a   : > { %2160 = vpow2.f32 %v491_v48  ;;  %v2126_v55 = vunpack.i.h.bf16 %v2124_v53  ;;  %v2125_v56 = vunpack.i.l.bf16 %v2124_v53 }
 0x40c   : > { %v2067_v58 = vpack.c.bf16 %v2126_v55, %v2125_v56 }
 0x414   : > { %v2161_v49 = vpop.eup %2160 }
 0x415   : > { %v493_v50 = vsel %vm486_vm3, %v2161_v49, 0.0 }
 0x416   : > { %494 = vadd.xlane.f32.xlu0 %v493_v50 }
 0x42c   : > { %587 = vrot.lane.b32.xlu0 %v2276_v5, %s2214_s25 }
 0x430   : > { %795 = vrot.lane.b32.xlu0 %v2308_v35, %s2214_s25 }
 0x4a3   : > { %v495_v52 = vpop.xlane.xlu0 %494 }
 0x4a4   : > { %2162 = vrcp.f32 %v495_v52 }
 0x4a7   : > { %v588_v59 = vpop.permute.xlu0 %587 }
 0x4ab   : > { %v796_v60 = vpop.permute.xlu0 %795 }
 0x4ae   : > { %v2163_v54 = vpop.eup %2162 }
 0x4af   : > { %v497_v57 = vmul.f32 %v2163_v54, %v2161_v49 }
 0x4b1   : > { %1985 = vmatmul.mubr.msk.f32.vlgmr.msra.gmra.mrb[2].mxu0 %vm486_vm3, %v497_v57 }
 0x4b2   : > { %1988 = vmatpush3.xpose.msk.msra.mxu0 %vm207_vm0, %v591_v45  ;;  %1989 = vmatprep.mubr.msk.f32.mxu0 %vm207_vm0, %v586_v51 }
 0x4b3   : > { %2066 = vmatprep.subr.bf16.mxu0 %v2210_v22 }
 0x4b5   : > { %1990 = vmatmul.mubr.msk.f32.vlgmr.msra.gmra.mrb[4].mxu0 %vm207_vm0, %v588_v59 }
 0x4b6   : > { %2069 = vmatpush3.bf16.xpose.msk.msra.mxu0 %vm2297_vm2, %v2067_v58  ;;  %2001 = vmatprep.mubr.msk.f32.mxu0 %vm2211_vm1, %v2212_v23 }
 0x4bd   : > { %2002 = vmatmul.mubr.msk.f32.vlgmr.msra.gmra.mrb[6].mxu0 %vm207_vm0, %v796_v60 }
 0x584   : > { %v573_v61 = vpop.f32.mrb[2].mxu0 }
 0x585   : > { %577 = vst.msk [vmem:[%s2346_s4] sm:$0xff] %vm207_vm0, %v573_v61  ;;  %v1986_v62 = vpop.f32.mrb[3].mxu0 }
 0x588   : > { %v1991_v63 = vpop.f32.mrb[4].mxu0 }
 0x589   : > { %v664_v1 = vpop.f32.mrb[5].mxu0  ;;  %v676_v3 = vsel %vm207_vm0, %v1991_v63, -inf }
 0x58a   : > { %677 = vmax.xlane.f32.xlu1 %v676_v3  ;;  %v673_v4 = vsel %vm207_vm0, %v664_v1, -inf }
 0x58b   : > { %674 = vmax.xlane.f32.xlu0 %v673_v4 }
 0x590   : > { %v875_v6 = vpop.f32.mrb[6].mxu0 }
 0x591   : > { %v879_v7 = vsel %vm486_vm3, %v875_v6, -inf  ;;  %v2003_v8 = vpop.f32.mrb[7].mxu0 }
 0x592   : > { %880 = vmax.xlane.f32.xlu0 %v879_v7 }
 0x59b   : > { %695 = vrot.lane.b32.xlu1 %v2267_v0, %s2215_s5 }
 0x59f   : > { %986 = vrot.lane.b32.xlu1 %v2267_v0, %s2216_s6 }
 0x5a3   : > { %981 = vrot.lane.b32.xlu1 %v2271_v2, %s2217_s7 }
 0x5a7   : > { %2133 = vrot.lane.b32.xlu1 %v2284_v10, %s2216_s6 }
 0x617   : > { %v678_v9 = vpop.xlane.xlu1 %677 }
 0x618   : > { %v680_v11 = vsub.f32 %v1991_v63, %v678_v9  ;;  %v675_v12 = vpop.xlane.xlu0 %674 }
 0x619   : > { %v679_v13 = vsub.f32 %v664_v1, %v675_v12 }
 0x61a   : > { %v683_v14 = vmul.f32 1.442695, %v680_v11 }
 0x61b   : > { %v681_v15 = vmul.f32 1.442695, %v679_v13  ;;  %v696_v20 = vpop.permute.xlu1 %695 }
 0x61c   : > { %2164 = vpow2.f32 %v683_v14  ;;  %1992 = vmatprep.subr.mxu1 %v696_v20 }
 0x61d   : > { %2166 = vpow2.f32 %v681_v15  ;;  %1993 = vmatpush3.msra.mxu1 %v696_v20 }
 0x61e   : > { %2070 = vmatprep.subr.bf16.mxu1 %v2210_v22 }
 0x61f   : > { %v881_v21 = vpop.xlane.xlu0 %880  ;;  %v987_v40 = vpop.permute.xlu1 %986 }
 0x620   : > { %v882_v24 = vsub.f32 %v875_v6, %v881_v21 }
 0x622   : > { %v883_v25 = vmul.f32 1.442695, %v882_v24 }
 0x623   : > { %v982_v42 = vpop.permute.xlu1 %981 }
 0x624   : > { %2168 = vpow2.f32 %v883_v25 }
 0x626   : > { %v2165_v16 = vpop.eup %2164 }
 0x627   : > { %v688_v17 = vsel %vm207_vm0, %v2165_v16, 0.0  ;;  %v2167_v18 = vpop.eup %2166  ;;  %v2134_v43 = vpop.permute.xlu1 %2133 }
 0x628   : > { %689 = vadd.xlane.f32.xlu0 %v688_v17  ;;  %v685_v19 = vsel %vm207_vm0, %v2167_v18, 0.0  ;;  %v2136_v45 = vunpack.i.h.bf16 %v2134_v43  ;;  %v2135_v46 = vunpack.i.l.bf16 %v2134_v43 }
 0x62a   : > { %v2074_v48 = vpack.c.bf16 %v2136_v45, %v2135_v46 }
 0x62c   : > { %686 = vadd.xlane.f32.xlu0 %v685_v19 }
 0x62e   : > { %v2169_v26 = vpop.eup %2168 }
 0x62f   : > { %v885_v27 = vsel %vm486_vm3, %v2169_v26, 0.0 }
 0x642   : > { %2128 = vrot.lane.b32.xlu0 %v2284_v10, %s2215_s5 }
 0x661   : > { %886 = vadd.xlane.f32.xlu0 %v885_v27 }
 0x677   : > { %983 = vrot.lane.b32.xlu0 %v2276_v5, %s2217_s7 }
 0x67b   : > { %1191 = vrot.lane.b32.xlu0 %v2308_v35, %s2217_s7 }
 0x6b5   : > { %v690_v28 = vpop.xlane.xlu0 %689 }
 0x6b6   : > { %2170 = vrcp.f32 %v690_v28 }
 0x6b9   : > { %v687_v29 = vpop.xlane.xlu0 %686 }
 0x6ba   : > { %2172 = vrcp.f32 %v687_v29 }
 0x6bd   : > { %v2129_v30 = vpop.permute.xlu0 %2128 }
 0x6be   : > { %v2131_v32 = vunpack.i.h.bf16 %v2129_v30  ;;  %v2130_v33 = vunpack.i.l.bf16 %v2129_v30 }
 0x6c0   : > { %v2171_v31 = vpop.eup %2170  ;;  %v2071_v39 = vpack.c.bf16 %v2131_v32, %v2130_v33 }
 0x6c1   : > { %v694_v38 = vmul.f32 %v2171_v31, %v2165_v16 }
 0x6c4   : > { %v2173_v36 = vpop.eup %2172 }
 0x6c5   : > { %v693_v37 = vmul.f32 %v2173_v36, %v2167_v18 }
 0x6c7   : > { %1994 = vmatprep.mubr.msk.f32.mxu1 %vm207_vm0, %v693_v37 }
 0x6c8   : > { %1995 = vmatmul.mubr.msk.f32.vlgmr.msra.gmra.mrb[4].mxu1 %vm207_vm0, %v694_v38 }
 0x6c9   : > { %2072 = vmatpush3.bf16.msra.mxu1 %v2071_v39  ;;  %2008 = vmatprep.mubr.msk.f32.mxu1 %vm2211_vm1, %v2212_v23 }
 0x6ca   : > { %2011 = vmatprep.subr.msk.mxu1 %vm207_vm0, %v987_v40 }
 0x6ee   : > { %v887_v41 = vpop.xlane.xlu0 %886 }
 0x6ef   : > { %2174 = vrcp.f32 %v887_v41 }
 0x6f2   : > { %v984_v49 = vpop.permute.xlu0 %983 }
 0x6f6   : > { %v1192_v50 = vpop.permute.xlu0 %1191 }
 0x6f9   : > { %v2175_v44 = vpop.eup %2174 }
 0x6fa   : > { %v889_v47 = vmul.f32 %v2175_v44, %v2169_v26 }
 0x6fc   : > { %2009 = vmatmul.mubr.msk.f32.vlgmr.msra.gmra.mrb[6].mxu1 %vm486_vm3, %v889_v47 }
 0x6fd   : > { %2012 = vmatpush3.xpose.msk.msra.mxu1 %vm207_vm0, %v987_v40  ;;  %2013 = vmatprep.mubr.msk.f32.mxu1 %vm207_vm0, %v982_v42 }
 0x6fe   : > { %2073 = vmatprep.subr.bf16.mxu1 %v2210_v22 }
 0x700   : > { %2014 = vmatmul.mubr.msk.f32.vlgmr.msra.gmra.mrb[8].mxu1 %vm207_vm0, %v984_v49 }
 0x701   : > { %2076 = vmatpush3.bf16.xpose.msk.msra.mxu1 %vm2297_vm2, %v2074_v48  ;;  %2025 = vmatprep.mubr.msk.f32.mxu1 %vm2211_vm1, %v2212_v23 }
 0x708   : > { %2026 = vmatmul.mubr.msk.f32.vlgmr.msra.gmra.mrb[10].mxu1 %vm207_vm0, %v1192_v50 }
 0x79b   : > { %v2379_v51 = vpop.f32.mrb[4].mxu1 }
 0x79c   : > { %v2381_v52 = vpop.f32.mrb[5].mxu1 }
 0x7cf   : > { %v2383_v53 = vpop.f32.mrb[6].mxu1 }
 0x7d0   : > { %v2010_v54 = vpop.f32.mrb[7].mxu1 }
 0x7d3   : > { %v2015_v55 = vpop.f32.mrb[8].mxu1 }
 0x7d4   : > { %v1060_v56 = vpop.f32.mrb[9].mxu1  ;;  %v1072_v57 = vsel %vm207_vm0, %v2015_v55, -inf }
 0x7d5   : > { %1073 = vmax.xlane.f32.xlu0 %v1072_v57  ;;  %v1069_v58 = vsel %vm207_vm0, %v1060_v56, -inf }
 0x7d6   : > { %1070 = vmax.xlane.f32.xlu1 %v1069_v58 }
 0x7db   : > { %v1271_v59 = vpop.f32.mrb[10].mxu1 }
 0x7dc   : > { %v1275_v60 = vsel %vm486_vm3, %v1271_v59, -inf  ;;  %v2027_v61 = vpop.f32.mrb[11].mxu1 }
 0x7dd   : > { %1276 = vmax.xlane.f32.xlu0 %v1275_v60 }
 0x7e7   : > { %2138 = vrot.lane.b32.xlu1 %v2284_v10, %s2218_s8 }
 0x7eb   : > { %1382 = vrot.lane.b32.xlu1 %v2267_v0, %s2219_s9 }
 0x862   : > { %v1074_v62 = vpop.xlane.xlu0 %1073 }
 0x863   : > { %v1076_v63 = vsub.f32 %v2015_v55, %v1074_v62  ;;  %v1071_v1 = vpop.xlane.xlu1 %1070 }
 0x864   : > { %v1075_v3 = vsub.f32 %v1060_v56, %v1071_v1 }
 0x865   : > { %v1079_v4 = vmul.f32 1.442695, %v1076_v63 }
 0x866   : > { %v1077_v6 = vmul.f32 1.442695, %v1075_v3 }
 0x867   : > { %2176 = vpow2.f32 %v1079_v4  ;;  %v2139_v17 = vpop.permute.xlu1 %2138 }
 0x868   : > { %2178 = vpow2.f32 %v1077_v6  ;;  %v2141_v25 = vunpack.i.h.bf16 %v2139_v17  ;;  %v2140_v26 = vunpack.i.l.bf16 %v2139_v17 }
 0x86a   : > { %v1277_v7 = vpop.xlane.xlu0 %1276 }
 0x86b   : > { %v1278_v8 = vsub.f32 %v1271_v59, %v1277_v7  ;;  %v1383_v18 = vpop.permute.xlu1 %1382 }
 0x86d   : > { %v1279_v9 = vmul.f32 1.442695, %v1278_v8 }
 0x86f   : > { %2180 = vpow2.f32 %v1279_v9 }
 0x871   : > { %v2177_v11 = vpop.eup %2176 }
 0x872   : > { %v2179_v12 = vpop.eup %2178  ;;  %v1084_v13 = vsel %vm207_vm0, %v2177_v11, 0.0 }
 0x873   : > { %1085 = vadd.xlane.f32.xlu0 %v1084_v13  ;;  %v1081_v14 = vsel %vm207_vm0, %v2179_v12, 0.0 }
 0x874   : > { %1082 = vadd.xlane.f32.xlu1 %v1081_v14 }
 0x879   : > { %v2181_v15 = vpop.eup %2180 }
 0x87a   : > { %v1281_v16 = vsel %vm486_vm3, %v2181_v15, 0.0 }
 0x87b   : > { %1282 = vadd.xlane.f32.xlu1 %v1281_v16 }
 0x889   : > { %1091 = vrot.lane.b32.xlu0 %v2267_v0, %s2218_s8 }
 0x88c   : > { %1377 = vrot.lane.b32.xlu1 %v2271_v2, %s2220_s10 }
 0x88d   : > { %2143 = vrot.lane.b32.xlu0 %v2284_v10, %s2219_s9 }
 0x890   : > { %1587 = vrot.lane.b32.xlu1 %v2308_v35, %s2220_s10 }
 0x891   : > { %1379 = vrot.lane.b32.xlu0 %v2276_v5, %s2220_s10  ;;  %v2078_v5 = vpack.c.bf16 %v2141_v25, %v2140_v26 }
 0x900   : > { %v1086_v19 = vpop.xlane.xlu0 %1085 }
 0x901   : > { %2182 = vrcp.f32 %v1086_v19  ;;  %v1083_v20 = vpop.xlane.xlu1 %1082 }
 0x902   : > { %2184 = vrcp.f32 %v1083_v20 }
 0x904   : > { %v1092_v21 = vpop.permute.xlu0 %1091 }
 0x905   : > { %2016 = vmatprep.subr.mxu0 %v1092_v21 }
 0x906   : > { %2017 = vmatpush3.msra.mxu0 %v1092_v21 }
 0x907   : > { %2077 = vmatprep.subr.bf16.mxu0 %v2210_v22 }
 0x908   : > { %v1283_v24 = vpop.xlane.xlu1 %1282  ;;  %v2144_v30 = vpop.permute.xlu0 %2143 }
 0x909   : > { %2186 = vrcp.f32 %v1283_v24  ;;  %v2146_v33 = vunpack.i.h.bf16 %v2144_v30  ;;  %v2145_v36 = vunpack.i.l.bf16 %v2144_v30 }
 0x90b   : > { %v2183_v2 = vpop.eup %2182  ;;  %v2081_v37 = vpack.c.bf16 %v2146_v33, %v2145_v36 }
 0x90c   : > { %v2185_v27 = vpop.eup %2184  ;;  %v1090_v28 = vmul.f32 %v2183_v2, %v2177_v11  ;;  %v1378_v32 = vpop.permute.xlu1 %1377 }
 0x90d   : > { %v1089_v35 = vmul.f32 %v2185_v27, %v2179_v12  ;;  %v1380_v38 = vpop.permute.xlu0 %1379 }
 0x90f   : > { %2018 = vmatprep.mubr.msk.f32.mxu0 %vm207_vm0, %v1089_v35 }
 0x910   : > { %2019 = vmatmul.mubr.msk.f32.vlgmr.msra.gmra.mrb[8].mxu0 %vm207_vm0, %v1090_v28  ;;  %v1588_v39 = vpop.permute.xlu1 %1587 }
 0x911   : > { %2079 = vmatpush3.bf16.msra.mxu0 %v2078_v5  ;;  %2032 = vmatprep.mubr.msk.f32.mxu0 %vm2211_vm1, %v2212_v23 }
 0x912   : > { %2035 = vmatprep.subr.msk.mxu0 %vm207_vm0, %v1383_v18 }
 0x913   : > { %v2187_v29 = vpop.eup %2186 }
 0x914   : > { %v1285_v31 = vmul.f32 %v2187_v29, %v2181_v15 }
 0x916   : > { %2033 = vmatmul.mubr.msk.f32.vlgmr.msra.gmra.mrb[10].mxu0 %vm486_vm3, %v1285_v31 }
 0x917   : > { %2037 = vmatprep.mubr.msk.f32.mxu0 %vm207_vm0, %v1378_v32 }
 0x91a   : > { %2036 = vmatpush3.xpose.msk.msra.mxu0 %vm207_vm0, %v1383_v18 }
 0x91b   : > { %2080 = vmatprep.subr.bf16.mxu0 %v2210_v22 }
 0x91d   : > { %2038 = vmatmul.mubr.msk.f32.vlgmr.msra.gmra.mrb[12].mxu0 %vm207_vm0, %v1380_v38 }
 0x91e   : > { %2083 = vmatpush3.bf16.xpose.msk.msra.mxu0 %vm2297_vm2, %v2081_v37  ;;  %2049 = vmatprep.mubr.msk.f32.mxu0 %vm2211_vm1, %v2212_v23 }
 0x925   : > { %2050 = vmatmul.mubr.msk.f32.vlgmr.msra.gmra.mrb[14].mxu0 %vm207_vm0, %v1588_v39 }
 0x9e3   : > { %v2020_v40 = vpop.f32.mrb[8].mxu0 }
 0x9e4   : > { %v1166_v41 = vpop.f32.mrb[9].mxu0 }
 0x9e9   : > { %v1361_v42 = vpop.f32.mrb[10].mxu0 }
 0x9ea   : > { %v2034_v43 = vpop.f32.mrb[11].mxu0 }
 0x9f0   : > { %v2039_v44 = vpop.f32.mrb[12].mxu0 }
 0x9f1   : > { %v1456_v45 = vpop.f32.mrb[13].mxu0  ;;  %v1468_v46 = vsel %vm207_vm0, %v2039_v44, -inf }
 0x9f2   : > { %1469 = vmax.xlane.f32.xlu1 %v1468_v46  ;;  %v1465_v47 = vsel %vm207_vm0, %v1456_v45, -inf }
 0x9f3   : > { %1466 = vmax.xlane.f32.xlu0 %v1465_v47 }
 0x9f8   : > { %v1667_v34 = vpop.f32.mrb[14].mxu0 }
 0x9f9   : > { %v2051_v48 = vpop.f32.mrb[15].mxu0  ;;  %v1671_v49 = vsel %vm486_vm3, %v1667_v34, -inf }
 0x9fa   : > { %1672 = vmax.xlane.f32.xlu0 %v1671_v49 }
 0xa7f   : > { %v1470_v50 = vpop.xlane.xlu1 %1469 }
 0xa80   : > { %v1472_v54 = vsub.f32 %v2039_v44, %v1470_v50  ;;  %v1467_v55 = vpop.xlane.xlu0 %1466 }
 0xa81   : > { %v1471_v56 = vsub.f32 %v1456_v45, %v1467_v55 }
 0xa82   : > { %v1475_v57 = vmul.f32 1.442695, %v1472_v54 }
 0xa83   : > { %v1473_v58 = vmul.f32 1.442695, %v1471_v56 }
 0xa84   : > { %2188 = vpow2.f32 %v1475_v57 }
 0xa85   : > { %2190 = vpow2.f32 %v1473_v58 }
 0xa87   : > { %v1673_v59 = vpop.xlane.xlu0 %1672 }
 0xa88   : > { %v1674_v60 = vsub.f32 %v1667_v34, %v1673_v59 }
 0xa8a   : > { %v1675_v61 = vmul.f32 1.442695, %v1674_v60 }
 0xa8c   : > { %2192 = vpow2.f32 %v1675_v61 }
 0xa8e   : > { %v2189_v62 = vpop.eup %2188 }
 0xa8f   : > { %v2191_v63 = vpop.eup %2190  ;;  %v1480_v1 = vsel %vm207_vm0, %v2189_v62, 0.0 }
 0xa90   : > { %1481 = vadd.xlane.f32.xlu1 %v1480_v1  ;;  %v1477_v3 = vsel %vm207_vm0, %v2191_v63, 0.0 }
 0xa91   : > { %1478 = vadd.xlane.f32.xlu0 %v1477_v3 }
 0xa96   : > { %v2193_v4 = vpop.eup %2192 }
 0xa97   : > { %v1677_v6 = vsel %vm486_vm3, %v2193_v4, 0.0 }
 0xa98   : > { %1678 = vadd.xlane.f32.xlu0 %v1677_v6 }
 0xaa1   : > { %1487 = vrot.lane.b32.xlu1 %v2267_v0, %s2221_s11 }
 0xaa5   : > { %781 = vrot.lane.b32.xlu1 %v2381_v52, %s2222_s13 }
 0xaa9   : > { %783 = vrot.lane.b32.xlu1 %v2379_v51, %s2222_s13 }
 0xaad   : > { %1177 = vrot.lane.b32.xlu1 %v1166_v41, %s2223_s14 }
 0xaae   : > { %2148 = vrot.lane.b32.xlu0 %v2284_v10, %s2221_s11 }
 0xab1   : > { %1366 = vrot.lane.b32.xlu1 %v1361_v42, %s2223_s14 }
 0xab2   : > { %970 = vrot.lane.b32.xlu0 %v2383_v53, %s2222_s13 }
 0xab6   : > { %1179 = vrot.lane.b32.xlu0 %v2020_v40, %s2223_s14 }
 0xb1d   : > { %v1482_v7 = vpop.xlane.xlu1 %1481 }
 0xb1e   : > { %2194 = vrcp.f32 %v1482_v7  ;;  %v1479_v8 = vpop.xlane.xlu0 %1478 }
 0xb1f   : > { %2196 = vrcp.f32 %v1479_v8 }
 0xb21   : > { %v1488_v0 = vpop.permute.xlu1 %1487 }
 0xb22   : > { %2040 = vmatprep.subr.mxu1 %v1488_v0 }
 0xb23   : > { %2041 = vmatpush3.msra.mxu1 %v1488_v0 }
 0xb24   : > { %2084 = vmatprep.subr.bf16.mxu1 %v2210_v22 }
 0xb25   : > { %v782_v51 = vpop.permute.xlu1 %781  ;;  %v1679_v52 = vpop.xlane.xlu0 %1678 }
 0xb26   : > { %788 = vst.msk [vmem:[%s2319_s28] sm:$0xff] %vm787_vm4, %v782_v51  ;;  %2198 = vrcp.f32 %v1679_v52 }
 0xb28   : > { %v2195_v10 = vpop.eup %2194 }
 0xb29   : > { %v2197_v53 = vpop.eup %2196  ;;  %v784_v9 = vpop.permute.xlu1 %783  ;;  %v1486_v15 = vmul.f32 %v2195_v10, %v2189_v62 }
 0xb2a   : > { %v2149_v11 = vpop.permute.xlu0 %2148  ;;  %789 = vst.msk [vmem:[%s2319_s28 + $0x8] sm:$0xff] %vm787_vm4, %v784_v9  ;;  %v1485_v14 = vmul.f32 %v2197_v53, %v2191_v63 }
 0xb2b   : > { %v2151_v12 = vunpack.i.h.bf16 %v2149_v11  ;;  %v2150_v13 = vunpack.i.l.bf16 %v2149_v11 }
 0xb2c   : > { %2042 = vmatprep.mubr.msk.f32.mxu1 %vm207_vm0, %v1485_v14 }
 0xb2d   : > { %v2085_v22 = vpack.c.bf16 %v2151_v12, %v2150_v13  ;;  %v1178_v16 = vpop.permute.xlu1 %1177  ;;  %2043 = vmatmul.mubr.msk.f32.vlgmr.msra.gmra.mrb[12].mxu1 %vm207_vm0, %v1486_v15 }
 0xb2e   : > { %v971_v17 = vpop.permute.xlu0 %970  ;;  %1184 = vst.msk [vmem:[%s2319_s28] sm:$0xff] %vm1183_vm5, %v1178_v16  ;;  %2056 = vmatprep.mubr.msk.f32.mxu1 %vm2211_vm1, %v2212_v23 }
 0xb2f   : > { %973 = vst.msk [vmem:[%s2346_s4] sm:$0xff] %vm787_vm4, %v971_v17  ;;  %2086 = vmatpush3.bf16.msra.mxu1 %v2085_v22 }
 0xb30   : > { %v2199_v18 = vpop.eup %2198 }
 0xb31   : > { %v1681_v19 = vmul.f32 %v2199_v18, %v2193_v4  ;;  %v1367_v20 = vpop.permute.xlu1 %1366 }
 0xb32   : > { %v1180_v21 = vpop.permute.xlu0 %1179  ;;  %1369 = vst.msk [vmem:[%s2346_s4] sm:$0xff] %vm1183_vm5, %v1367_v20 }
 0xb33   : > { %1185 = vst.msk [vmem:[%s2319_s28 + $0x8] sm:$0xff] %vm1183_vm5, %v1180_v21  ;;  %2057 = vmatmul.mubr.msk.f32.vlgmr.msra.gmra.mrb[14].mxu1 %vm486_vm3, %v1681_v19 }
 0xc00   : > { %v2044_v24 = vpop.f32.mrb[12].mxu1 }
 0xc01   : > { %1575 = vrot.lane.b32.xlu1 %v2044_v24, %s2224_s15  ;;  %v1562_v2 = vpop.f32.mrb[13].mxu1 }
 0xc02   : > { %1573 = vrot.lane.b32.xlu0 %v1562_v2, %s2224_s15 }
 0xc06   : > { %v1757_v25 = vpop.f32.mrb[14].mxu1 }
 0xc07   : > { %1762 = vrot.lane.b32.xlu0 %v1757_v25, %s2224_s15  ;;  %v2058_v26 = vpop.f32.mrb[15].mxu1 }
 0xc73   : > { %v1576_v23 = vpop.permute.xlu1 %1575 }
 0xc74   : > { %1581 = vst.msk [vmem:[%s2319_s28 + $0x8] sm:$0xff] %vm1579_vm6, %v1576_v23  ;;  %v1574_v27 = vpop.permute.xlu0 %1573 }
 0xc75   : > { %1580 = vst.msk [vmem:[%s2319_s28] sm:$0xff] %vm1579_vm6, %v1574_v27 }
 0xc79   : > { %v1763_v35 = vpop.permute.xlu0 %1762 }
 0xc7a   : > { %1765 = vst.msk [vmem:[%s2346_s4] sm:$0xff] %vm1579_vm6, %v1763_v35 }
 0xc7b PF: > { %s14_s12 = sadd.s32 1, %s2206_s12  }
 0xc7c   : > { %p11_p4 = scmp.ge.s32.totalorder %s14_s12, 4  }
 0xc7e   :  { %13 = sbr.rel (!%p11_p4) target bundleno = 1 (0x1), region = 73 }

// kernel: co_attentional_forward.9
= control target key start
LH: loop header
LB: loop body
LE: loop exit
PB: predicated region body
PF: predicated region fallthrough
CT: control target
= control target key end

     0   :  { %vm19_vm0 = vcmask 261120   ;;  %v204_v6 = vmov 0.0   ;;  %s269_s0 = inlined_call_operand.vmem [shape: f32[16,32], index: 0, kind: input, shape index: {}]   ;;  %s270_s1 = inlined_call_operand.vmem [shape: f32[32,32], index: 1, kind: input, shape index: {}]   ;;  %s271_s2 = inlined_call_operand.vmem [shape: f32[1,32], index: 2, kind: input, shape index: {}]   ;;  %s272_s3 = inlined_call_operand.hbm [shape: f32[16,32], index: 3, kind: output, shape index: {}]  }
   0x1   :  { %v26_v0 = vld [vmem:[%s270_s1] sm:$0xff]  ;;  %v27_v1 = vld [vmem:[%s270_s1 + $0x8] sm:$0xff]  ;;  %v28_v2 = vld [vmem:[%s270_s1 + $0x10] sm:$0xff]  ;;  %21 = vst.msk [vmem:[#allocation2 + $0x8] sm:$0xff] %vm19_vm0, %v204_v6 }
   0x2   :  { %v168_v3 = vpack.c.bf16 %v27_v1, %v26_v0  ;;  %v29_v4 = vld [vmem:[%s270_s1 + $0x18] sm:$0xff]  ;;  %v24_v5 = vld [vmem:[%s269_s0] sm:$0xff]  ;;  %20 = vst.msk [vmem:[#allocation2] sm:$0xff] %vm19_vm0, %v204_v6 }
   0x3   :  { %v172_v7 = vpack.c.bf16 %v29_v4, %v28_v2  ;;  %165 = vmatprep.mubr.msk.f32.mxu0 %vm19_vm0, %v24_v5 }
   0x4   :  { %8 = vsyncpa [#allocation4], 0  ;;  %169 = vmatprep.subr.bf16.mxu0 %v168_v3  ;;  %v25_v8 = vld [vmem:[%s269_s0 + $0x8] sm:$0xff]  ;;  %v150_v15 = vld [vmem:[%s271_s2] ss:$0 sm:$0xff]  ;;  %s205_s25 = smov [#allocation3]  }
   0x5   :  { %171 = vmatpush3.bf16.msra.mxu0 %v168_v3  ;;  %s137_s26 = sshll.u32 %s205_s25, 4  ;;  %s138_s26 = int_to_ptr.vmem [resolvable:$true] %s137_s26 }
   0x6   :  { %173 = vmatprep.subr.bf16.mxu0 %v172_v7  ;;  %s180_s0 = scalar_lea.vmem %s138_s26, 256  ;;  %p185_p1 = scmp.lt.s32.totalorder %s138_s26, %s138_s26 }
   0x7   :  { %p181_p0 = scmp.ne.s32.totalorder %s138_s26, %s180_s0  ;;  %p186_p2 = scmp.lt.s32.totalorder %s180_s0, %s180_s0 }
   0x8   :  { %v23_v9 = vld [vmem:[#allocation2 + $0x8] sm:$0xff] }
   0x9   :  { %175 = vmatpush3.bf16.msra.mxu0 %v172_v7  ;;  %v22_v10 = vld [vmem:[#allocation2] sm:$0xff]  ;;  %p187_p3 = por %p186_p2, %p185_p1 }
   0xb   :  { %p188_p4 = pnand %p187_p3, %p181_p0 }
   0xc   :  { %166 = vmatmul.mubr.msk.f32.vlgmr.msra.gmra.mrb[0].mxu0 %vm19_vm0, %v25_v8 }
  0xdf   :  { %v167_v11 = vpop.f32.mrb[0].mxu0 }
  0xe0   :  { %v113_v12 = vadd.f32 %v167_v11, %v23_v9  ;;  %v103_v13 = vpop.f32.mrb[1].mxu0 }
  0xe1   :  { %v112_v14 = vadd.f32 %v103_v13, %v22_v10 }
  0xe2   :  { %115 = vst.msk [vmem:[#allocation2 + $0x8] sm:$0xff] %vm19_vm0, %v113_v12 }
  0xe3   :  { %114 = vst.msk [vmem:[#allocation2] sm:$0xff] %vm19_vm0, %v112_v14 }
  0xe9   :  { %v120_v16 = vld [vmem:[#allocation2 + $0x8] sm:$0xff] }
  0xea   :  { %v119_v17 = vld [vmem:[#allocation2] sm:$0xff]  ;;  %v129_v18 = vadd.f32 %v150_v15, %v120_v16 }
  0xeb   :  { %v128_v19 = vadd.f32 %v150_v15, %v119_v17 }
  0xec   :  { %131 = vst.msk [vmem:[#allocation3 + $0x8] sm:$0xff] %vm19_vm0, %v129_v18 }
  0xed   :  { %130 = vst.msk [vmem:[#allocation3] sm:$0xff] %vm19_vm0, %v128_v19 }
  0xee   :  { %191 = shalt.err (!%p188_p4)
}
  0xef   :  { %s192_s28 = scalar_lea.hbm %s272_s3, 256 }
  0xf0   :  { %p193_p5 = scmp.ne.s32.totalorder %s272_s3, %s192_s28  ;;  %p196_p6 = scmp.lt.u32.totalorder %s192_s28, %s272_s3 }
  0xf2   :  { %p198_p7 = pnand %p196_p6, %p193_p5 }
  0xf4   :  { %201 = shalt.err (!%p198_p7)
}
  0xf5   :  { %s206_s6 = smov 128   ;;  %s207_s7 = smov 8  }
  0xf6   :  { %143 = dma.vmem_to_hbm [thread:$0]  %s138_s26, 256, %s272_s3, [#allocation4], %s206_s6, %s206_s6, %s207_s7  }
  0xf7   :  { %202 = dma.done.wait [#allocation4], 256  }
  0xf8   :  { %203 = vsyncadd [#allocation4], 4294967040 }
  0xf9   :  { %147 = vsyncpa [#allocation4], 1 }

</bundles_post_ra>
